<compile_context>
chip_gen: v7x
topology: tpu7x:2x2x1
jax: 0.10.0
libtpu: 0.0.40
codegen_flags: <defaults>
</compile_context>

<pallas_src>
import numpy as np
import jax
import jax.numpy as jnp
from jax import lax
from jax.experimental import pallas as pl
from jax.experimental.pallas import tpu as pltpu

HI = lax.Precision.HIGHEST      # tiny channel-mixing matmuls (K = C or 3C)
DEF = lax.Precision.DEFAULT     # big K = HW DFT matmuls (single-pass bf16 MXU)


# ----------------------------------------------------------------------------
# Pallas kernel (factory closes over the static spatial shape)
# ----------------------------------------------------------------------------
def _make_hda_kernel(H, W):
    HW = H * W
    inv_hw = 1.0 / float(HW)
    # roll amounts for the 9 depthwise-conv taps, flat row-major layout,
    # tap order k = 3*(dh+1) + (dw+1)  (matches the weight / mask tables)
    shifts = tuple((-(dh * W + dw)) % HW for dh in (-1, 0, 1) for dw in (-1, 0, 1))

    def kernel(x_ref, w1_ref, b1_ref, w2_ref, b2_ref, alpha_ref, beta_ref,
               g1_ref, g2_ref, wconv_ref, bconv_ref,
               wpi_ref, wdw_ref, wpo_ref, k2r_ref, k2i_ref, mask_ref, out_ref):
        f32 = jnp.float32

        def mm(a, b, prec):
            return jnp.dot(a, b, preferred_element_type=f32, precision=prec)

        xf = x_ref[0]                                   # (C, HW), lane-dense

        # ------------------------- FDPA -------------------------
        x1 = mm(w1_ref[...], xf, HI) + b1_ref[...]      # (C, HW)
        x2 = mm(w2_ref[...], xf, HI) + b2_ref[...]      # (C, HW)

        k2r = k2r_ref[...]                              # (HW, HW) Re{kron DFT}
        k2i = k2i_ref[...]                              # (HW, HW) Im{kron DFT}

        # fft2(x2): per-row flat Kronecker DFT (matrices are symmetric)
        x2f_r = mm(x2, k2r, DEF)
        x2f_i = mm(x2, k2i, DEF)

        # x1 (real) * fft2(x2)
        yr = x1 * x2f_r
        yi = x1 * x2f_i

        # ifft2 = (1/HW) * Y @ conj(K)   (conj(K) = k2r - i*k2i)
        zr = (mm(yr, k2r, DEF) + mm(yi, k2i, DEF)) * inv_hw
        zi = (mm(yi, k2r, DEF) - mm(yr, k2i, DEF)) * inv_hw
        mag = jnp.sqrt(zr * zr + zi * zi)               # (C, HW)

        fpa = mag * alpha_ref[...] + xf * beta_ref[...]

        # ---------- bias-free LayerNorm over the channel axis ----------
        def cnorm(z, gamma):
            mu = jnp.mean(z, axis=0, keepdims=True)
            ms = jnp.mean(z * z, axis=0, keepdims=True)
            var = ms - mu * mu                          # one-pass biased var
            return z * lax.rsqrt(var + 1e-5) * gamma    # rsqrt -> EUP slot

        n1 = cnorm(fpa, g1_ref[...])

        # squeeze attention: AdaptiveAvgPool2d(1) -> 1x1 conv
        pooled = jnp.mean(n1, axis=1, keepdims=True)                 # (C, 1)
        s_attn = mm(wconv_ref[...], pooled, HI) + bconv_ref[...]     # (C, 1)

        out2 = xf + s_attn * fpa                                     # residual

        n2 = cnorm(out2, g2_ref[...])

        # ------------------------- FFN -------------------------
        pin = mm(wpi_ref[...], n2, HI)                  # (2*hid, HW)
        wtaps = wdw_ref[...]                            # (9, 2*hid, 1)
        masks = mask_ref[...]                           # (9, HW) boundary masks

        # 3x3 depthwise conv: 9 lane-rolls + masked VPU FMAs (no matmuls)
        acc = wtaps[4] * pin                            # center tap (dh=0, dw=0)
        for k, s in enumerate(shifts):
            if s == 0:
                continue
            rolled = pltpu.roll(pin, shift=s, axis=1)
            acc = acc + wtaps[k] * (rolled * masks[k:k + 1, :])

        hid = wpo_ref.shape[1]
        g = jnp.maximum(acc[:hid], 0.0) * acc[hid:]     # relu(x1) * x2
        ffn = mm(wpo_ref[...], g, HI)                   # (C, HW)

        out_ref[0] = out2 + ffn                         # lane-dense store

    return kernel


# ----------------------------------------------------------------------------
# Host-side precomputation
# ----------------------------------------------------------------------------
def kron_dft_mats(H, W):
    """Real/imag parts of the (HW, HW) Kronecker 2-D DFT matrix (symmetric)."""
    def dft(n):
        k = np.arange(n)
        th = 2.0 * np.pi * np.outer(k, k) / n
        return np.cos(th), -np.sin(th)
    frh, fih = dft(H)
    frw, fiw = dft(W)
    k2r = np.kron(frh, frw) - np.kron(fih, fiw)
    k2i = np.kron(frh, fiw) + np.kron(fih, frw)
    return jnp.asarray(k2r, jnp.float32), jnp.asarray(k2i, jnp.float32)


def dw_masks(H, W):
    """(9, HW) f32 validity masks for zero-padded 3x3 depthwise conv taps."""
    masks = np.zeros((9, H * W), np.float32)
    hh = np.arange(H)[:, None]
    ww = np.arange(W)[None, :]
    k = 0
    for dh in (-1, 0, 1):
        for dw in (-1, 0, 1):
            m = ((hh + dh >= 0) & (hh + dh < H) & (ww + dw >= 0) & (ww + dw < W))
            masks[k] = m.astype(np.float32).reshape(-1)
            k += 1
    return jnp.asarray(masks)


# ----------------------------------------------------------------------------
# Wrapper
# ----------------------------------------------------------------------------
def hybrid_domain_attention(x, kp, k2r, k2i, masks):
    B, C, H, W = x.shape
    HW = H * W
    xf = x.reshape(B, C, HW)                            # lane-dense kernel I/O

    inputs = [xf, kp["w1"], kp["b1"], kp["w2"], kp["b2"], kp["alpha"], kp["beta"],
              kp["gamma1"], kp["gamma2"], kp["wconv"], kp["bconv"],
              kp["wpi"], kp["wdw"], kp["wpo"], k2r, k2i, masks]

    def full_spec(arr):
        nd = arr.ndim
        return pl.BlockSpec(arr.shape, lambda b, _nd=nd: (0,) * _nd)

    in_specs = [pl.BlockSpec((1, C, HW), lambda b: (b, 0, 0))]
    in_specs += [full_spec(a) for a in inputs[1:]]

    out = pl.pallas_call(
        _make_hda_kernel(H, W),
        out_shape=jax.ShapeDtypeStruct((B, C, HW), jnp.float32),
        grid=(B,),
        in_specs=in_specs,
        out_specs=pl.BlockSpec((1, C, HW), lambda b: (b, 0, 0)),
        compiler_params=pltpu.CompilerParams(dimension_semantics=("parallel",)),
    )(*inputs)
    return out.reshape(B, C, H, W)


# ----------------------------------------------------------------------------
# Deterministic parameter init (shapes from the PyTorch __init__)
# ----------------------------------------------------------------------------
def init_params(key, dim):
    hidden = dim * 3
    k = jax.random.split(key, 10)
    n = lambda kk, s, sc=0.3: jax.random.normal(kk, s, jnp.float32) * sc
    return dict(
        w1=n(k[0], (dim, dim)), b1=n(k[1], (dim,), 0.1),
        w2=n(k[2], (dim, dim)), b2=n(k[3], (dim,), 0.1),
        # module init has alpha=zeros / beta=ones; alpha is set nonzero here so
        # the FFT branch is actually exercised numerically.
        alpha=n(k[4], (dim,), 0.5),
        beta=jnp.ones((dim,), jnp.float32),
        gamma1=jnp.ones((dim,), jnp.float32),
        gamma2=jnp.ones((dim,), jnp.float32),
        wconv=n(k[5], (dim, dim)), bconv=n(k[6], (dim,), 0.1),
        wpi=n(k[7], (2 * hidden, dim)),
        wdw=n(k[8], (2 * hidden, 3, 3)),
        wpo=n(k[9], (dim, hidden)),
    )


def kernel_params(p):
    col = lambda v: v.reshape(-1, 1)
    h2 = p["wdw"].shape[0]
    # (2*hid, 3, 3) -> (9, 2*hid, 1), tap-major (k = 3*kh + kw)
    wdw_taps = jnp.transpose(p["wdw"].reshape(h2, 9), (1, 0))[:, :, None]
    return dict(
        w1=p["w1"], b1=col(p["b1"]), w2=p["w2"], b2=col(p["b2"]),
        alpha=col(p["alpha"]), beta=col(p["beta"]),
        gamma1=col(p["gamma1"]), gamma2=col(p["gamma2"]),
        wconv=p["wconv"], bconv=col(p["bconv"]),
        wpi=p["wpi"], wdw=wdw_taps, wpo=p["wpo"],
    )


# ----------------------------------------------------------------------------
# Pure-JAX reference (mirrors the PyTorch forward)
# ----------------------------------------------------------------------------
def _conv1x1(x, w, b=None):
    y = jnp.einsum('oc,bchw->bohw', w, x, precision=HI)
    if b is not None:
        y = y + b.reshape(1, -1, 1, 1)
    return y


def reference(x, p):
    def ln(z, gamma):
        var = jnp.var(z, axis=1, keepdims=True)
        return z / jnp.sqrt(var + 1e-5) * gamma.reshape(1, -1, 1, 1)

    x1 = _conv1x1(x, p["w1"], p["b1"])
    x2 = _conv1x1(x, p["w2"], p["b2"])
    x2f = jnp.fft.fft2(x2)
    o = jnp.abs(jnp.fft.ifft2(x1 * x2f, axes=(-2, -1)))
    fpa = o * p["alpha"].reshape(1, -1, 1, 1) + x * p["beta"].reshape(1, -1, 1, 1)

    n1 = ln(fpa, p["gamma1"])
    pooled = jnp.mean(n1, axis=(2, 3), keepdims=True)
    s_attn = _conv1x1(pooled, p["wconv"], p["bconv"])
    out = x + s_attn * fpa

    n2 = ln(out, p["gamma2"])
    pin = _conv1x1(n2, p["wpi"])
    dw = lax.conv_general_dilated(
        pin, p["wdw"][:, None, :, :], window_strides=(1, 1),
        padding=((1, 1), (1, 1)), dimension_numbers=('NCHW', 'OIHW', 'NCHW'),
        feature_group_count=pin.shape[1], precision=HI)
    hid = p["wpo"].shape[1]
    g = jax.nn.relu(dw[:, :hid]) * dw[:, hid:]
    ffn = _conv1x1(g, p["wpo"])
    return out + ffn


# ----------------------------------------------------------------------------
if __name__ == "__main__":
    B, C, H, W = 2, 4, 16, 16
    key = jax.random.PRNGKey(0)
    kx, kparam = jax.random.split(key)
    x = jax.random.normal(kx, (B, C, H, W), jnp.float32)

    params = init_params(kparam, C)
    kp = kernel_params(params)
    k2r, k2i = kron_dft_mats(H, W)
    masks = dw_masks(H, W)

    out = jax.block_until_ready(hybrid_domain_attention(x, kp, k2r, k2i, masks))
    ref = jax.block_until_ready(reference(x, params))
    assert out.shape == (B, C, H, W)

    # The K=HW DFT matmuls run single-pass bf16 on the MXU (precision=DEFAULT),
    # so tolerance is slightly looser than the all-f32-HIGHEST version.
    err = float(jnp.max(jnp.abs(out - ref)))
    if not err < 1e-2:
        raise AssertionError(f"kernel/reference mismatch, max abs err = {err}")
    print("KERNEL_OK")
</pallas_src>

<mosaic_0001>
module attributes {stable_mosaic.version = 11 : i64} {
  func.func @kernel(%arg0: i32, %arg1: memref<1x4x256xf32, #tpu.memory_space<vmem>>, %arg2: memref<4x4xf32, #tpu.memory_space<vmem>>, %arg3: memref<4x1xf32, #tpu.memory_space<vmem>>, %arg4: memref<4x4xf32, #tpu.memory_space<vmem>>, %arg5: memref<4x1xf32, #tpu.memory_space<vmem>>, %arg6: memref<4x1xf32, #tpu.memory_space<vmem>>, %arg7: memref<4x1xf32, #tpu.memory_space<vmem>>, %arg8: memref<4x1xf32, #tpu.memory_space<vmem>>, %arg9: memref<4x1xf32, #tpu.memory_space<vmem>>, %arg10: memref<4x4xf32, #tpu.memory_space<vmem>>, %arg11: memref<4x1xf32, #tpu.memory_space<vmem>>, %arg12: memref<24x4xf32, #tpu.memory_space<vmem>>, %arg13: memref<9x24x1xf32, #tpu.memory_space<vmem>>, %arg14: memref<4x12xf32, #tpu.memory_space<vmem>>, %arg15: memref<256x256xf32, #tpu.memory_space<vmem>>, %arg16: memref<256x256xf32, #tpu.memory_space<vmem>>, %arg17: memref<9x256xf32, #tpu.memory_space<vmem>>, %arg18: memref<1x4x256xf32, #tpu.memory_space<vmem>>) attributes {dimension_semantics = [#tpu.dimension_semantics<parallel>], iteration_bounds = array<i64: 2>, scalar_prefetch = 0 : i64, scratch_operands = 0 : i64, tpu.core_type = #tpu.core_type<tc>, window_params = [{transform_indices = @transform_0, window_bounds = array<i64: 1, 4, 256>}, {pipeline_mode = #tpu.pipeline_mode<synchronous>, transform_indices = @transform_1, window_bounds = array<i64: 4, 4>}, {pipeline_mode = #tpu.pipeline_mode<synchronous>, transform_indices = @transform_2, window_bounds = array<i64: 4, 1>}, {pipeline_mode = #tpu.pipeline_mode<synchronous>, transform_indices = @transform_3, window_bounds = array<i64: 4, 4>}, {pipeline_mode = #tpu.pipeline_mode<synchronous>, transform_indices = @transform_4, window_bounds = array<i64: 4, 1>}, {pipeline_mode = #tpu.pipeline_mode<synchronous>, transform_indices = @transform_5, window_bounds = array<i64: 4, 1>}, {pipeline_mode = #tpu.pipeline_mode<synchronous>, transform_indices = @transform_6, window_bounds = array<i64: 4, 1>}, {pipeline_mode = #tpu.pipeline_mode<synchronous>, transform_indices = @transform_7, window_bounds = array<i64: 4, 1>}, {pipeline_mode = #tpu.pipeline_mode<synchronous>, transform_indices = @transform_8, window_bounds = array<i64: 4, 1>}, {pipeline_mode = #tpu.pipeline_mode<synchronous>, transform_indices = @transform_9, window_bounds = array<i64: 4, 4>}, {pipeline_mode = #tpu.pipeline_mode<synchronous>, transform_indices = @transform_10, window_bounds = array<i64: 4, 1>}, {pipeline_mode = #tpu.pipeline_mode<synchronous>, transform_indices = @transform_11, window_bounds = array<i64: 24, 4>}, {pipeline_mode = #tpu.pipeline_mode<synchronous>, transform_indices = @transform_12, window_bounds = array<i64: 9, 24, 1>}, {pipeline_mode = #tpu.pipeline_mode<synchronous>, transform_indices = @transform_13, window_bounds = array<i64: 4, 12>}, {pipeline_mode = #tpu.pipeline_mode<synchronous>, transform_indices = @transform_14, window_bounds = array<i64: 256, 256>}, {pipeline_mode = #tpu.pipeline_mode<synchronous>, transform_indices = @transform_15, window_bounds = array<i64: 256, 256>}, {pipeline_mode = #tpu.pipeline_mode<synchronous>, transform_indices = @transform_16, window_bounds = array<i64: 9, 256>}, {transform_indices = @transform_17, window_bounds = array<i64: 1, 4, 256>}]} {
    %c0 = arith.constant 0 : index
    %c0_0 = arith.constant 0 : index
    %c0_1 = arith.constant 0 : index
    %0 = vector.load %arg1[%c0, %c0_0, %c0_1] : memref<1x4x256xf32, #tpu.memory_space<vmem>>, vector<1x4x256xf32>
    %1 = vector.shape_cast %0 : vector<1x4x256xf32> to vector<4x256xf32>
    %c0_2 = arith.constant 0 : index
    %c0_3 = arith.constant 0 : index
    %2 = vector.load %arg2[%c0_2, %c0_3] : memref<4x4xf32, #tpu.memory_space<vmem>>, vector<4x4xf32>
    %cst = arith.constant dense<0.000000e+00> : vector<4x256xf32>
    %3 = tpu.matmul %2, %1, %cst {dimension_numbers = #tpu.dot_dimension_numbers<[1], [0], [0], [1], [0, 0, 1, 1], [], []>, precision = #tpu.contract_precision<fp32>} : vector<4x4xf32>, vector<4x256xf32>, vector<4x256xf32> -> vector<4x256xf32>
    %c0_4 = arith.constant 0 : index
    %c0_5 = arith.constant 0 : index
    %4 = vector.load %arg3[%c0_4, %c0_5] : memref<4x1xf32, #tpu.memory_space<vmem>>, vector<4x1xf32>
    %5 = vector.broadcast %4 : vector<4x1xf32> to vector<4x256xf32>
    %6 = arith.addf %3, %5 : vector<4x256xf32>
    %c0_6 = arith.constant 0 : index
    %c0_7 = arith.constant 0 : index
    %7 = vector.load %arg4[%c0_6, %c0_7] : memref<4x4xf32, #tpu.memory_space<vmem>>, vector<4x4xf32>
    %cst_8 = arith.constant dense<0.000000e+00> : vector<4x256xf32>
    %8 = tpu.matmul %7, %1, %cst_8 {dimension_numbers = #tpu.dot_dimension_numbers<[1], [0], [0], [1], [0, 0, 1, 1], [], []>, precision = #tpu.contract_precision<fp32>} : vector<4x4xf32>, vector<4x256xf32>, vector<4x256xf32> -> vector<4x256xf32>
    %c0_9 = arith.constant 0 : index
    %c0_10 = arith.constant 0 : index
    %9 = vector.load %arg5[%c0_9, %c0_10] : memref<4x1xf32, #tpu.memory_space<vmem>>, vector<4x1xf32>
    %10 = vector.broadcast %9 : vector<4x1xf32> to vector<4x256xf32>
    %11 = arith.addf %8, %10 : vector<4x256xf32>
    %c0_11 = arith.constant 0 : index
    %c0_12 = arith.constant 0 : index
    %12 = vector.load %arg15[%c0_11, %c0_12] : memref<256x256xf32, #tpu.memory_space<vmem>>, vector<256x256xf32>
    %c0_13 = arith.constant 0 : index
    %c0_14 = arith.constant 0 : index
    %13 = vector.load %arg16[%c0_13, %c0_14] : memref<256x256xf32, #tpu.memory_space<vmem>>, vector<256x256xf32>
    %cst_15 = arith.constant dense<0.000000e+00> : vector<4x256xf32>
    %14 = tpu.matmul %11, %12, %cst_15 {dimension_numbers = #tpu.dot_dimension_numbers<[1], [0], [0], [1], [0, 0, 1, 1], [], []>} : vector<4x256xf32>, vector<256x256xf32>, vector<4x256xf32> -> vector<4x256xf32>
    %cst_16 = arith.constant dense<0.000000e+00> : vector<4x256xf32>
    %15 = tpu.matmul %11, %13, %cst_16 {dimension_numbers = #tpu.dot_dimension_numbers<[1], [0], [0], [1], [0, 0, 1, 1], [], []>} : vector<4x256xf32>, vector<256x256xf32>, vector<4x256xf32> -> vector<4x256xf32>
    %16 = arith.mulf %6, %14 : vector<4x256xf32>
    %17 = arith.mulf %6, %15 : vector<4x256xf32>
    %cst_17 = arith.constant dense<0.000000e+00> : vector<4x256xf32>
    %18 = tpu.matmul %16, %12, %cst_17 {dimension_numbers = #tpu.dot_dimension_numbers<[1], [0], [0], [1], [0, 0, 1, 1], [], []>} : vector<4x256xf32>, vector<256x256xf32>, vector<4x256xf32> -> vector<4x256xf32>
    %cst_18 = arith.constant dense<0.000000e+00> : vector<4x256xf32>
    %19 = tpu.matmul %17, %13, %cst_18 {dimension_numbers = #tpu.dot_dimension_numbers<[1], [0], [0], [1], [0, 0, 1, 1], [], []>} : vector<4x256xf32>, vector<256x256xf32>, vector<4x256xf32> -> vector<4x256xf32>
    %20 = arith.addf %18, %19 : vector<4x256xf32>
    %cst_19 = arith.constant 3.906250e-03 : f32
    %21 = vector.broadcast %cst_19 : f32 to vector<4x256xf32>
    %22 = arith.mulf %20, %21 : vector<4x256xf32>
    %cst_20 = arith.constant dense<0.000000e+00> : vector<4x256xf32>
    %23 = tpu.matmul %17, %12, %cst_20 {dimension_numbers = #tpu.dot_dimension_numbers<[1], [0], [0], [1], [0, 0, 1, 1], [], []>} : vector<4x256xf32>, vector<256x256xf32>, vector<4x256xf32> -> vector<4x256xf32>
    %cst_21 = arith.constant dense<0.000000e+00> : vector<4x256xf32>
    %24 = tpu.matmul %16, %13, %cst_21 {dimension_numbers = #tpu.dot_dimension_numbers<[1], [0], [0], [1], [0, 0, 1, 1], [], []>} : vector<4x256xf32>, vector<256x256xf32>, vector<4x256xf32> -> vector<4x256xf32>
    %25 = arith.subf %23, %24 : vector<4x256xf32>
    %cst_22 = arith.constant 3.906250e-03 : f32
    %26 = vector.broadcast %cst_22 : f32 to vector<4x256xf32>
    %27 = arith.mulf %25, %26 : vector<4x256xf32>
    %28 = arith.mulf %22, %22 : vector<4x256xf32>
    %29 = arith.mulf %27, %27 : vector<4x256xf32>
    %30 = arith.addf %28, %29 : vector<4x256xf32>
    %31 = math.sqrt %30 : vector<4x256xf32>
    %c0_23 = arith.constant 0 : index
    %c0_24 = arith.constant 0 : index
    %32 = vector.load %arg6[%c0_23, %c0_24] : memref<4x1xf32, #tpu.memory_space<vmem>>, vector<4x1xf32>
    %33 = vector.broadcast %32 : vector<4x1xf32> to vector<4x256xf32>
    %34 = arith.mulf %31, %33 : vector<4x256xf32>
    %c0_25 = arith.constant 0 : index
    %c0_26 = arith.constant 0 : index
    %35 = vector.load %arg7[%c0_25, %c0_26] : memref<4x1xf32, #tpu.memory_space<vmem>>, vector<4x1xf32>
    %36 = vector.broadcast %35 : vector<4x1xf32> to vector<4x256xf32>
    %37 = arith.mulf %1, %36 : vector<4x256xf32>
    %38 = arith.addf %34, %37 : vector<4x256xf32>
    %c0_27 = arith.constant 0 : index
    %c0_28 = arith.constant 0 : index
    %39 = vector.load %arg8[%c0_27, %c0_28] : memref<4x1xf32, #tpu.memory_space<vmem>>, vector<4x1xf32>
    %cst_29 = arith.constant dense<0.000000e+00> : vector<256xf32>
    %40 = vector.multi_reduction <add>, %38, %cst_29 [0] : vector<4x256xf32> to vector<256xf32>
    %41 = vector.shape_cast %40 : vector<256xf32> to vector<1x256xf32>
    %cst_30 = arith.constant 4.000000e+00 : f32
    %42 = vector.broadcast %cst_30 : f32 to vector<1x256xf32>
    %43 = arith.divf %41, %42 : vector<1x256xf32>
    %44 = arith.mulf %38, %38 : vector<4x256xf32>
    %cst_31 = arith.constant dense<0.000000e+00> : vector<256xf32>
    %45 = vector.multi_reduction <add>, %44, %cst_31 [0] : vector<4x256xf32> to vector<256xf32>
    %46 = vector.shape_cast %45 : vector<256xf32> to vector<1x256xf32>
    %cst_32 = arith.constant 4.000000e+00 : f32
    %47 = vector.broadcast %cst_32 : f32 to vector<1x256xf32>
    %48 = arith.divf %46, %47 : vector<1x256xf32>
    %49 = arith.mulf %43, %43 : vector<1x256xf32>
    %50 = arith.subf %48, %49 : vector<1x256xf32>
    %cst_33 = arith.constant 9.99999974E-6 : f32
    %51 = vector.broadcast %cst_33 : f32 to vector<1x256xf32>
    %52 = arith.addf %50, %51 : vector<1x256xf32>
    %53 = math.rsqrt %52 : vector<1x256xf32>
    %54 = vector.broadcast %53 : vector<1x256xf32> to vector<4x256xf32>
    %55 = arith.mulf %38, %54 : vector<4x256xf32>
    %56 = vector.broadcast %39 : vector<4x1xf32> to vector<4x256xf32>
    %57 = arith.mulf %55, %56 : vector<4x256xf32>
    %cst_34 = arith.constant dense<0.000000e+00> : vector<4xf32>
    %58 = vector.multi_reduction <add>, %57, %cst_34 [1] : vector<4x256xf32> to vector<4xf32>
    %59 = vector.shape_cast %58 : vector<4xf32> to vector<4x1xf32>
    %cst_35 = arith.constant 2.560000e+02 : f32
    %60 = vector.broadcast %cst_35 : f32 to vector<4x1xf32>
    %61 = arith.divf %59, %60 : vector<4x1xf32>
    %c0_36 = arith.constant 0 : index
    %c0_37 = arith.constant 0 : index
    %62 = vector.load %arg10[%c0_36, %c0_37] : memref<4x4xf32, #tpu.memory_space<vmem>>, vector<4x4xf32>
    %cst_38 = arith.constant dense<0.000000e+00> : vector<4x1xf32>
    %63 = tpu.matmul %62, %61, %cst_38 {dimension_numbers = #tpu.dot_dimension_numbers<[1], [0], [0], [1], [0, 0, 1, 1], [], []>, precision = #tpu.contract_precision<fp32>} : vector<4x4xf32>, vector<4x1xf32>, vector<4x1xf32> -> vector<4x1xf32>
    %c0_39 = arith.constant 0 : index
    %c0_40 = arith.constant 0 : index
    %64 = vector.load %arg11[%c0_39, %c0_40] : memref<4x1xf32, #tpu.memory_space<vmem>>, vector<4x1xf32>
    %65 = arith.addf %63, %64 : vector<4x1xf32>
    %66 = vector.broadcast %65 : vector<4x1xf32> to vector<4x256xf32>
    %67 = arith.mulf %66, %38 : vector<4x256xf32>
    %68 = arith.addf %1, %67 : vector<4x256xf32>
    %c0_41 = arith.constant 0 : index
    %c0_42 = arith.constant 0 : index
    %69 = vector.load %arg9[%c0_41, %c0_42] : memref<4x1xf32, #tpu.memory_space<vmem>>, vector<4x1xf32>
    %cst_43 = arith.constant dense<0.000000e+00> : vector<256xf32>
    %70 = vector.multi_reduction <add>, %68, %cst_43 [0] : vector<4x256xf32> to vector<256xf32>
    %71 = vector.shape_cast %70 : vector<256xf32> to vector<1x256xf32>
    %cst_44 = arith.constant 4.000000e+00 : f32
    %72 = vector.broadcast %cst_44 : f32 to vector<1x256xf32>
    %73 = arith.divf %71, %72 : vector<1x256xf32>
    %74 = arith.mulf %68, %68 : vector<4x256xf32>
    %cst_45 = arith.constant dense<0.000000e+00> : vector<256xf32>
    %75 = vector.multi_reduction <add>, %74, %cst_45 [0] : vector<4x256xf32> to vector<256xf32>
    %76 = vector.shape_cast %75 : vector<256xf32> to vector<1x256xf32>
    %cst_46 = arith.constant 4.000000e+00 : f32
    %77 = vector.broadcast %cst_46 : f32 to vector<1x256xf32>
    %78 = arith.divf %76, %77 : vector<1x256xf32>
    %79 = arith.mulf %73, %73 : vector<1x256xf32>
    %80 = arith.subf %78, %79 : vector<1x256xf32>
    %cst_47 = arith.constant 9.99999974E-6 : f32
    %81 = vector.broadcast %cst_47 : f32 to vector<1x256xf32>
    %82 = arith.addf %80, %81 : vector<1x256xf32>
    %83 = math.rsqrt %82 : vector<1x256xf32>
    %84 = vector.broadcast %83 : vector<1x256xf32> to vector<4x256xf32>
    %85 = arith.mulf %68, %84 : vector<4x256xf32>
    %86 = vector.broadcast %69 : vector<4x1xf32> to vector<4x256xf32>
    %87 = arith.mulf %85, %86 : vector<4x256xf32>
    %c0_48 = arith.constant 0 : index
    %c0_49 = arith.constant 0 : index
    %88 = vector.load %arg12[%c0_48, %c0_49] : memref<24x4xf32, #tpu.memory_space<vmem>>, vector<24x4xf32>
    %cst_50 = arith.constant dense<0.000000e+00> : vector<24x256xf32>
    %89 = tpu.matmul %88, %87, %cst_50 {dimension_numbers = #tpu.dot_dimension_numbers<[1], [0], [0], [1], [0, 0, 1, 1], [], []>, precision = #tpu.contract_precision<fp32>} : vector<24x4xf32>, vector<4x256xf32>, vector<24x256xf32> -> vector<24x256xf32>
    %c0_51 = arith.constant 0 : index
    %c0_52 = arith.constant 0 : index
    %c0_53 = arith.constant 0 : index
    %90 = vector.load %arg13[%c0_51, %c0_52, %c0_53] : memref<9x24x1xf32, #tpu.memory_space<vmem>>, vector<9x24x1xf32>
    %c0_54 = arith.constant 0 : index
    %c0_55 = arith.constant 0 : index
    %91 = vector.load %arg17[%c0_54, %c0_55] : memref<9x256xf32, #tpu.memory_space<vmem>>, vector<9x256xf32>
    %92 = vector.extract_strided_slice %90 {offsets = [4, 0, 0], sizes = [1, 24, 1], strides = [1, 1, 1]} : vector<9x24x1xf32> to vector<1x24x1xf32>
    %93 = vector.shape_cast %92 : vector<1x24x1xf32> to vector<24x1xf32>
    %94 = vector.broadcast %93 : vector<24x1xf32> to vector<24x256xf32>
    %95 = arith.mulf %94, %89 : vector<24x256xf32>
    %c17_i32 = arith.constant 17 : i32
    %96 = tpu.dynamic_rotate %89 by %c17_i32 dim 1 : vector<24x256xf32>, i32 -> vector<24x256xf32>
    %97 = vector.extract_strided_slice %90 {offsets = [0, 0, 0], sizes = [1, 24, 1], strides = [1, 1, 1]} : vector<9x24x1xf32> to vector<1x24x1xf32>
    %98 = vector.shape_cast %97 : vector<1x24x1xf32> to vector<24x1xf32>
    %99 = vector.extract_strided_slice %91 {offsets = [0, 0], sizes = [1, 256], strides = [1, 1]} : vector<9x256xf32> to vector<1x256xf32>
    %100 = vector.broadcast %99 : vector<1x256xf32> to vector<24x256xf32>
    %101 = arith.mulf %96, %100 : vector<24x256xf32>
    %102 = vector.broadcast %98 : vector<24x1xf32> to vector<24x256xf32>
    %103 = arith.mulf %102, %101 : vector<24x256xf32>
    %104 = arith.addf %95, %103 : vector<24x256xf32>
    %c16_i32 = arith.constant 16 : i32
    %105 = tpu.dynamic_rotate %89 by %c16_i32 dim 1 : vector<24x256xf32>, i32 -> vector<24x256xf32>
    %106 = vector.extract_strided_slice %90 {offsets = [1, 0, 0], sizes = [1, 24, 1], strides = [1, 1, 1]} : vector<9x24x1xf32> to vector<1x24x1xf32>
    %107 = vector.shape_cast %106 : vector<1x24x1xf32> to vector<24x1xf32>
    %108 = vector.extract_strided_slice %91 {offsets = [1, 0], sizes = [1, 256], strides = [1, 1]} : vector<9x256xf32> to vector<1x256xf32>
    %109 = vector.broadcast %108 : vector<1x256xf32> to vector<24x256xf32>
    %110 = arith.mulf %105, %109 : vector<24x256xf32>
    %111 = vector.broadcast %107 : vector<24x1xf32> to vector<24x256xf32>
    %112 = arith.mulf %111, %110 : vector<24x256xf32>
    %113 = arith.addf %104, %112 : vector<24x256xf32>
    %c15_i32 = arith.constant 15 : i32
    %114 = tpu.dynamic_rotate %89 by %c15_i32 dim 1 : vector<24x256xf32>, i32 -> vector<24x256xf32>
    %115 = vector.extract_strided_slice %90 {offsets = [2, 0, 0], sizes = [1, 24, 1], strides = [1, 1, 1]} : vector<9x24x1xf32> to vector<1x24x1xf32>
    %116 = vector.shape_cast %115 : vector<1x24x1xf32> to vector<24x1xf32>
    %117 = vector.extract_strided_slice %91 {offsets = [2, 0], sizes = [1, 256], strides = [1, 1]} : vector<9x256xf32> to vector<1x256xf32>
    %118 = vector.broadcast %117 : vector<1x256xf32> to vector<24x256xf32>
    %119 = arith.mulf %114, %118 : vector<24x256xf32>
    %120 = vector.broadcast %116 : vector<24x1xf32> to vector<24x256xf32>
    %121 = arith.mulf %120, %119 : vector<24x256xf32>
    %122 = arith.addf %113, %121 : vector<24x256xf32>
    %c1_i32 = arith.constant 1 : i32
    %123 = tpu.dynamic_rotate %89 by %c1_i32 dim 1 : vector<24x256xf32>, i32 -> vector<24x256xf32>
    %124 = vector.extract_strided_slice %90 {offsets = [3, 0, 0], sizes = [1, 24, 1], strides = [1, 1, 1]} : vector<9x24x1xf32> to vector<1x24x1xf32>
    %125 = vector.shape_cast %124 : vector<1x24x1xf32> to vector<24x1xf32>
    %126 = vector.extract_strided_slice %91 {offsets = [3, 0], sizes = [1, 256], strides = [1, 1]} : vector<9x256xf32> to vector<1x256xf32>
    %127 = vector.broadcast %126 : vector<1x256xf32> to vector<24x256xf32>
    %128 = arith.mulf %123, %127 : vector<24x256xf32>
    %129 = vector.broadcast %125 : vector<24x1xf32> to vector<24x256xf32>
    %130 = arith.mulf %129, %128 : vector<24x256xf32>
    %131 = arith.addf %122, %130 : vector<24x256xf32>
    %c255_i32 = arith.constant 255 : i32
    %132 = tpu.dynamic_rotate %89 by %c255_i32 dim 1 : vector<24x256xf32>, i32 -> vector<24x256xf32>
    %133 = vector.extract_strided_slice %90 {offsets = [5, 0, 0], sizes = [1, 24, 1], strides = [1, 1, 1]} : vector<9x24x1xf32> to vector<1x24x1xf32>
    %134 = vector.shape_cast %133 : vector<1x24x1xf32> to vector<24x1xf32>
    %135 = vector.extract_strided_slice %91 {offsets = [5, 0], sizes = [1, 256], strides = [1, 1]} : vector<9x256xf32> to vector<1x256xf32>
    %136 = vector.broadcast %135 : vector<1x256xf32> to vector<24x256xf32>
    %137 = arith.mulf %132, %136 : vector<24x256xf32>
    %138 = vector.broadcast %134 : vector<24x1xf32> to vector<24x256xf32>
    %139 = arith.mulf %138, %137 : vector<24x256xf32>
    %140 = arith.addf %131, %139 : vector<24x256xf32>
    %c241_i32 = arith.constant 241 : i32
    %141 = tpu.dynamic_rotate %89 by %c241_i32 dim 1 : vector<24x256xf32>, i32 -> vector<24x256xf32>
    %142 = vector.extract_strided_slice %90 {offsets = [6, 0, 0], sizes = [1, 24, 1], strides = [1, 1, 1]} : vector<9x24x1xf32> to vector<1x24x1xf32>
    %143 = vector.shape_cast %142 : vector<1x24x1xf32> to vector<24x1xf32>
    %144 = vector.extract_strided_slice %91 {offsets = [6, 0], sizes = [1, 256], strides = [1, 1]} : vector<9x256xf32> to vector<1x256xf32>
    %145 = vector.broadcast %144 : vector<1x256xf32> to vector<24x256xf32>
    %146 = arith.mulf %141, %145 : vector<24x256xf32>
    %147 = vector.broadcast %143 : vector<24x1xf32> to vector<24x256xf32>
    %148 = arith.mulf %147, %146 : vector<24x256xf32>
    %149 = arith.addf %140, %148 : vector<24x256xf32>
    %c240_i32 = arith.constant 240 : i32
    %150 = tpu.dynamic_rotate %89 by %c240_i32 dim 1 : vector<24x256xf32>, i32 -> vector<24x256xf32>
    %151 = vector.extract_strided_slice %90 {offsets = [7, 0, 0], sizes = [1, 24, 1], strides = [1, 1, 1]} : vector<9x24x1xf32> to vector<1x24x1xf32>
    %152 = vector.shape_cast %151 : vector<1x24x1xf32> to vector<24x1xf32>
    %153 = vector.extract_strided_slice %91 {offsets = [7, 0], sizes = [1, 256], strides = [1, 1]} : vector<9x256xf32> to vector<1x256xf32>
    %154 = vector.broadcast %153 : vector<1x256xf32> to vector<24x256xf32>
    %155 = arith.mulf %150, %154 : vector<24x256xf32>
    %156 = vector.broadcast %152 : vector<24x1xf32> to vector<24x256xf32>
    %157 = arith.mulf %156, %155 : vector<24x256xf32>
    %158 = arith.addf %149, %157 : vector<24x256xf32>
    %c239_i32 = arith.constant 239 : i32
    %159 = tpu.dynamic_rotate %89 by %c239_i32 dim 1 : vector<24x256xf32>, i32 -> vector<24x256xf32>
    %160 = vector.extract_strided_slice %90 {offsets = [8, 0, 0], sizes = [1, 24, 1], strides = [1, 1, 1]} : vector<9x24x1xf32> to vector<1x24x1xf32>
    %161 = vector.shape_cast %160 : vector<1x24x1xf32> to vector<24x1xf32>
    %162 = vector.extract_strided_slice %91 {offsets = [8, 0], sizes = [1, 256], strides = [1, 1]} : vector<9x256xf32> to vector<1x256xf32>
    %163 = vector.broadcast %162 : vector<1x256xf32> to vector<24x256xf32>
    %164 = arith.mulf %159, %163 : vector<24x256xf32>
    %165 = vector.broadcast %161 : vector<24x1xf32> to vector<24x256xf32>
    %166 = arith.mulf %165, %164 : vector<24x256xf32>
    %167 = arith.addf %158, %166 : vector<24x256xf32>
    %168 = vector.extract_strided_slice %167 {offsets = [0, 0], sizes = [12, 256], strides = [1, 1]} : vector<24x256xf32> to vector<12x256xf32>
    %cst_56 = arith.constant 0.000000e+00 : f32
    %169 = vector.broadcast %cst_56 : f32 to vector<12x256xf32>
    %170 = arith.maximumf %168, %169 : vector<12x256xf32>
    %171 = vector.extract_strided_slice %167 {offsets = [12, 0], sizes = [12, 256], strides = [1, 1]} : vector<24x256xf32> to vector<12x256xf32>
    %172 = arith.mulf %170, %171 : vector<12x256xf32>
    %c0_57 = arith.constant 0 : index
    %c0_58 = arith.constant 0 : index
    %173 = vector.load %arg14[%c0_57, %c0_58] : memref<4x12xf32, #tpu.memory_space<vmem>>, vector<4x12xf32>
    %cst_59 = arith.constant dense<0.000000e+00> : vector<4x256xf32>
    %174 = tpu.matmul %173, %172, %cst_59 {dimension_numbers = #tpu.dot_dimension_numbers<[1], [0], [0], [1], [0, 0, 1, 1], [], []>, precision = #tpu.contract_precision<fp32>} : vector<4x12xf32>, vector<12x256xf32>, vector<4x256xf32> -> vector<4x256xf32>
    %175 = arith.addf %68, %174 : vector<4x256xf32>
    %c0_60 = arith.constant 0 : index
    %c0_61 = arith.constant 0 : index
    %c0_62 = arith.constant 0 : index
    %176 = vector.load %arg18[%c0_60, %c0_61, %c0_62] : memref<1x4x256xf32, #tpu.memory_space<vmem>>, vector<1x4x256xf32>
    %177 = vector.shape_cast %176 : vector<1x4x256xf32> to vector<4x256xf32>
    %178 = vector.shape_cast %175 : vector<4x256xf32> to vector<1x4x256xf32>
    tpu.vector_store %arg18[%c0_60, %c0_61, %c0_62], %178 {strides = array<i32>} : memref<1x4x256xf32, #tpu.memory_space<vmem>>, vector<1x4x256xf32>,
    return
  }
  func.func @transform_0(%arg0: i32) -> (i32, i32, i32) {
    %c0_i32 = arith.constant 0 : i32
    %c0_i32_0 = arith.constant 0 : i32
    %c0_i32_1 = arith.constant 0 : i32
    return %arg0, %c0_i32, %c0_i32_0 : i32, i32, i32
  }
  func.func @transform_1(%arg0: i32) -> (i32, i32) {
    %c0_i32 = arith.constant 0 : i32
    %c0_i32_0 = arith.constant 0 : i32
    %c0_i32_1 = arith.constant 0 : i32
    return %c0_i32, %c0_i32_0 : i32, i32
  }
  func.func @transform_2(%arg0: i32) -> (i32, i32) {
    %c0_i32 = arith.constant 0 : i32
    %c0_i32_0 = arith.constant 0 : i32
    %c0_i32_1 = arith.constant 0 : i32
    return %c0_i32, %c0_i32_0 : i32, i32
  }
  func.func @transform_3(%arg0: i32) -> (i32, i32) {
    %c0_i32 = arith.constant 0 : i32
    %c0_i32_0 = arith.constant 0 : i32
    %c0_i32_1 = arith.constant 0 : i32
    return %c0_i32, %c0_i32_0 : i32, i32
  }
  func.func @transform_4(%arg0: i32) -> (i32, i32) {
    %c0_i32 = arith.constant 0 : i32
    %c0_i32_0 = arith.constant 0 : i32
    %c0_i32_1 = arith.constant 0 : i32
    return %c0_i32, %c0_i32_0 : i32, i32
  }
  func.func @transform_5(%arg0: i32) -> (i32, i32) {
    %c0_i32 = arith.constant 0 : i32
    %c0_i32_0 = arith.constant 0 : i32
    %c0_i32_1 = arith.constant 0 : i32
    return %c0_i32, %c0_i32_0 : i32, i32
  }
  func.func @transform_6(%arg0: i32) -> (i32, i32) {
    %c0_i32 = arith.constant 0 : i32
    %c0_i32_0 = arith.constant 0 : i32
    %c0_i32_1 = arith.constant 0 : i32
    return %c0_i32, %c0_i32_0 : i32, i32
  }
  func.func @transform_7(%arg0: i32) -> (i32, i32) {
    %c0_i32 = arith.constant 0 : i32
    %c0_i32_0 = arith.constant 0 : i32
    %c0_i32_1 = arith.constant 0 : i32
    return %c0_i32, %c0_i32_0 : i32, i32
  }
  func.func @transform_8(%arg0: i32) -> (i32, i32) {
    %c0_i32 = arith.constant 0 : i32
    %c0_i32_0 = arith.constant 0 : i32
    %c0_i32_1 = arith.constant 0 : i32
    return %c0_i32, %c0_i32_0 : i32, i32
  }
  func.func @transform_9(%arg0: i32) -> (i32, i32) {
    %c0_i32 = arith.constant 0 : i32
    %c0_i32_0 = arith.constant 0 : i32
    %c0_i32_1 = arith.constant 0 : i32
    return %c0_i32, %c0_i32_0 : i32, i32
  }
  func.func @transform_10(%arg0: i32) -> (i32, i32) {
    %c0_i32 = arith.constant 0 : i32
    %c0_i32_0 = arith.constant 0 : i32
    %c0_i32_1 = arith.constant 0 : i32
    return %c0_i32, %c0_i32_0 : i32, i32
  }
  func.func @transform_11(%arg0: i32) -> (i32, i32) {
    %c0_i32 = arith.constant 0 : i32
    %c0_i32_0 = arith.constant 0 : i32
    %c0_i32_1 = arith.constant 0 : i32
    return %c0_i32, %c0_i32_0 : i32, i32
  }
  func.func @transform_12(%arg0: i32) -> (i32, i32, i32) {
    %c0_i32 = arith.constant 0 : i32
    %c0_i32_0 = arith.constant 0 : i32
    %c0_i32_1 = arith.constant 0 : i32
    %c0_i32_2 = arith.constant 0 : i32
    return %c0_i32, %c0_i32_0, %c0_i32_1 : i32, i32, i32
  }
  func.func @transform_13(%arg0: i32) -> (i32, i32) {
    %c0_i32 = arith.constant 0 : i32
    %c0_i32_0 = arith.constant 0 : i32
    %c0_i32_1 = arith.constant 0 : i32
    return %c0_i32, %c0_i32_0 : i32, i32
  }
  func.func @transform_14(%arg0: i32) -> (i32, i32) {
    %c0_i32 = arith.constant 0 : i32
    %c0_i32_0 = arith.constant 0 : i32
    %c0_i32_1 = arith.constant 0 : i32
    return %c0_i32, %c0_i32_0 : i32, i32
  }
  func.func @transform_15(%arg0: i32) -> (i32, i32) {
    %c0_i32 = arith.constant 0 : i32
    %c0_i32_0 = arith.constant 0 : i32
    %c0_i32_1 = arith.constant 0 : i32
    return %c0_i32, %c0_i32_0 : i32, i32
  }
  func.func @transform_16(%arg0: i32) -> (i32, i32) {
    %c0_i32 = arith.constant 0 : i32
    %c0_i32_0 = arith.constant 0 : i32
    %c0_i32_1 = arith.constant 0 : i32
    return %c0_i32, %c0_i32_0 : i32, i32
  }
  func.func @transform_17(%arg0: i32) -> (i32, i32, i32) {
    %c0_i32 = arith.constant 0 : i32
    %c0_i32_0 = arith.constant 0 : i32
    %c0_i32_1 = arith.constant 0 : i32
    return %arg0, %c0_i32, %c0_i32_0 : i32, i32, i32
  }
}

</mosaic_0001>

<bundles_post_ra>
// kernel: tpu_custom_call.1
= control target key start
LH: loop header
LB: loop body
LE: loop exit
PB: predicated region body
PF: predicated region fallthrough
CT: control target
= control target key end

     0   :  { %s6624_s0 = inlined_call_operand.vmem [shape: f32[2,4,256], index: 0, kind: input, shape index: {}]   ;;  %s6625_s1 = inlined_call_operand.vmem [shape: f32[4,4], index: 1, kind: input, shape index: {}]   ;;  %s6626_s2 = inlined_call_operand.vmem [shape: f32[4,1], index: 2, kind: input, shape index: {}]   ;;  %s6627_s3 = inlined_call_operand.vmem [shape: f32[4,4], index: 3, kind: input, shape index: {}]   ;;  %s6628_s4 = inlined_call_operand.vmem [shape: f32[4,1], index: 4, kind: input, shape index: {}]   ;;  %s6629_s5 = inlined_call_operand.vmem [shape: f32[4,1], index: 5, kind: input, shape index: {}]   ;;  %s6630_s6 = inlined_call_operand.vmem [shape: f32[4,1], index: 6, kind: input, shape index: {}]   ;;  %s6631_s7 = inlined_call_operand.vmem [shape: f32[4,1], index: 7, kind: input, shape index: {}]   ;;  %s6632_s8 = inlined_call_operand.vmem [shape: f32[4,1], index: 8, kind: input, shape index: {}]   ;;  %s6633_s9 = inlined_call_operand.vmem [shape: f32[4,4], index: 9, kind: input, shape index: {}]   ;;  %s6634_s10 = inlined_call_operand.vmem [shape: f32[4,1], index: 10, kind: input, shape index: {}]   ;;  %s6635_s11 = inlined_call_operand.vmem [shape: f32[24,4], index: 11, kind: input, shape index: {}]   ;;  %s6636_s12 = inlined_call_operand.vmem [shape: f32[9,24,1], index: 12, kind: input, shape index: {}]   ;;  %s6637_s13 = inlined_call_operand.vmem [shape: f32[4,12], index: 13, kind: input, shape index: {}]   ;;  %s6638_s14 = inlined_call_operand.hbm [shape: f32[256,256], index: 14, kind: input, shape index: {}]   ;;  %s6639_s15 = inlined_call_operand.hbm [shape: f32[256,256], index: 15, kind: input, shape index: {}]   ;;  %s6640_s16 = inlined_call_operand.vmem [shape: f32[9,256], index: 16, kind: input, shape index: {}]   ;;  %s6641_s17 = inlined_call_operand.hbm [shape: f32[2,4,256], index: 17, kind: output, shape index: {}]  }
   0x1   :  { %6689 = sst [smem:[#allocation36_spill]] %s6624_s0 }
   0x2   :  { %6690 = sst [smem:[#allocation37_spill]] %s6625_s1 }
   0x3   :  { %6691 = sst [smem:[#allocation38_spill]] %s6641_s17 }
   0x4   :  { %22 = vsyncpa [#allocation3], 0 }
   0x5   :  { %23 = vsyncpa [#allocation6], 0 }
   0x6   :  { %24 = vsyncpa [#allocation4], 0 }
   0x7   :  { %26 = vsyncpa [#allocation4 + $0x1], 0  ;;  %s5352_s24 = smov 0   ;;  %s5354_s25 = smov 0  }
   0x8   :  { %s5356_s26 = smov 0   ;;  %s5358_s27 = smov 0  }
   0x9 LB: > { %6692 = sst [smem:[#allocation11_spill]] %s5231_s24  ;;  %s5373_s28 = sadd.s32 4294967295, %s5243_s27   ;;  %s5243_s27 = sphi %s5358_s27, %s6773_s27   ;;  %s5239_s26 = sphi %s5356_s26, %s6776_s26   ;;  %s5235_s25 = sphi %s5354_s25, %s6775_s25   ;;  %s5231_s24 = sphi %s5352_s24, %s6774_s24  }
   0xa   : > { %6693 = sst [smem:[#allocation12_spill]] %s5235_s25  ;;  %s4480_s29 = sadd.s32 4294967294, %s5243_s27  }
   0xb   : > { %6694 = sst [smem:[#allocation13_spill]] %s5239_s26  ;;  %s5377_s0 = sadd.s32 1, %s5243_s27  }
   0xc   : > { %6695 = sst [smem:[#allocation14_spill]] %s5243_s27  ;;  %s401_s30 = sadd.s32 1, %s5239_s26 }
   0xd   : > { %6696 = sst [smem:[#allocation15_spill]] %s5377_s0  ;;  %s398_s18 = ssub.s32 %s5243_s27, %s5377_s0 }
   0xe   : > { %p411_p0 = scmp.ne.s32.totalorder %s5239_s26, %s5235_s25  ;;  %p399_p1 = scmp.eq.s32.totalorder %s398_s18, 0 }
   0xf   : > { %p412_p2 = scmp.eq.s32.totalorder %s5373_s28, 1  ;;  %p417_p3 = scmp.ne.s32.totalorder %s5235_s25, %s5231_s24 }
  0x10   : > { %p418_p4 = scmp.eq.s32.totalorder %s4480_s29, 1  ;;  %p4481_p7 = scmp.ge.s32.totalorder %s5243_s27, 1 }
  0x11   : > { %s5388_s19 = scalar_select %p399_p1, %s5239_s26, %s401_s30  }
  0x12   : > { %p5390_p5 = por %p412_p2, %p411_p0  ;;  %p5394_p6 = por %p418_p4, %p417_p3 }
  0x13   : > { %6697 = sst [smem:[#allocation16_spill]] %s5388_s19  ;;  %p425_p8 = scmp.lt.s32.totalorder %s5243_s27, 3 }
  0x14   : > { %s6698_s1 = scalar_select %p5390_p5, 1, 0 }
  0x15   : > { %s6700_s20 = scalar_select %p5394_p6, 1, 0 }
  0x16   : > { %6699 = sst [smem:[#allocation17_spill]] %s6698_s1  ;;  %p6648_p9 = scmp.eq.s32.totalorder %s5373_s28, 0 }
  0x17   : > { %6701 = sst [smem:[#allocation18_spill]] %s6700_s20  ;;  %p5401_p10 = pnand %p4481_p7, %p425_p8 }
  0x18   : > { %s5245_s22 = smov [#allocation2]   ;;  %s5246_s30 = smov [#allocation5]  }
  0x19   : > { %s6702_s21 = scalar_select %p5401_p10, 1, 0 }
  0x1a   : > { %s476_s23 = sshll.u32 %s5245_s22, 4  ;;  %p5037_p11 = pneg %p5401_p10  ;;  %s477_s23 = int_to_ptr.vmem [resolvable:$true] %s476_s23 }
  0x1b   : > { %s489_s18 = sshll.u32 %s5246_s30, 4  ;;  %s5117_s0 = scalar_lea.hbm %s6638_s14, 8192  ;;  %s5413_s18 = int_to_ptr.vmem [resolvable:$true] %s489_s18 }
  0x1c   : > { %p5409_p12 = pnand %p6648_p9, %p5037_p11  ;;  %p5118_p13 = scmp.ne.s32.totalorder %s6638_s14, %s5117_s0 }
  0x1d   : > { %p5124_p3 = scmp.lt.u32.totalorder %s5117_s0, %s6638_s14 }
  0x1e   : > { %p5119_p0 = pneg %p5409_p12 }
  0x20   : > { %p5120_p1 = pnand %p5119_p0, %p5118_p13 }
  0x22   : > { %p5121_p2 = pneg %p5120_p1 }
  0x24   : > { %p5126_p4 = pnand %p5124_p3, %p5121_p2 }
  0x26   : > { %5129 = shalt.err (!%p5126_p4)
}
  0x27   : > { %s5130_s30 = scalar_lea.vmem %s477_s23, 8192  ;;  %p5138_p9 = scmp.lt.s32.totalorder %s477_s23, %s477_s23 }
  0x28   : > { %p5131_p7 = scmp.ne.s32.totalorder %s477_s23, %s5130_s30  ;;  %p5139_p6 = scmp.lt.s32.totalorder %s5130_s30, %s5130_s30 }
  0x2a   : > { %p5133_p8 = pnand %p5131_p7, %p5119_p0  ;;  %p5140_p5 = por %p5139_p6, %p5138_p9 }
  0x2c   : > { %p5134_p11 = pneg %p5133_p8 }
  0x2e   : > { %p5141_p10 = pnand %p5140_p5, %p5134_p11 }
  0x30   : > { %5144 = shalt.err (!%p5141_p10)
}
  0x31   : > { %s5247_s26 = smov 256   ;;  %s5248_s19 = smov 16  }
  0x32   : > { %5040 = dma.hbm_to_vmem [thread:$0]  (!%p5409_p12), %s6638_s14, 8192, %s477_s23, [#allocation3], %s5247_s26, %s5247_s26, %s5248_s19  }
  0x33   : > { %s5145_s22 = scalar_lea.hbm %s6639_s15, 8192 }
  0x34   : > { %p5146_p13 = scmp.ne.s32.totalorder %s6639_s15, %s5145_s22  ;;  %p5152_p9 = scmp.lt.u32.totalorder %s5145_s22, %s6639_s15 }
  0x36   : > { %p5148_p5 = pnand %p5146_p13, %p5119_p0 }
  0x38   : > { %p5149_p6 = pneg %p5148_p5 }
  0x3a   : > { %p5154_p10 = pnand %p5152_p9, %p5149_p6 }
  0x3c   : > { %5157 = shalt.err (!%p5154_p10)
}
  0x3d   : > { %s5158_s23 = scalar_lea.vmem %s5413_s18, 8192  ;;  %p5166_p4 = scmp.lt.s32.totalorder %s5413_s18, %s5413_s18 }
  0x3e   : > { %p5159_p1 = scmp.ne.s32.totalorder %s5413_s18, %s5158_s23  ;;  %p5167_p7 = scmp.lt.s32.totalorder %s5158_s23, %s5158_s23 }
  0x40   : > { %p5161_p2 = pnand %p5159_p1, %p5119_p0  ;;  %p5168_p8 = por %p5167_p7, %p5166_p4 }
  0x42   : > { %p5162_p3 = pneg %p5161_p2 }
  0x44   : > { %p5169_p11 = pnand %p5168_p8, %p5162_p3 }
  0x46   : > { %5172 = shalt.err (!%p5169_p11)
}
  0x47   : > { %5043 = dma.hbm_to_vmem [thread:$0]  (!%p5409_p12), %s6639_s15, 8192, %s5413_s18, [#allocation6], %s5247_s26, %s5247_s26, %s5248_s19  }
  0x48   : > { %p6704_p13 = scmp.ne.s32.totalorder %s6702_s21, 0 }
  0x4a   : > { %516 = sbr.rel (%p6704_p13) target bundleno = 2274 (0x8e2), region = 88 }
  0x51   : > { %p6705_p5 = scmp.eq.s32.totalorder %s5373_s28, 0 }
  0x53   : > { %5218 = dma.done.wait (%p6705_p5), [#allocation3], 8192   ;;  %p6706_p0 = pmov %p6705_p5 }
  0x55   : > { %5220 = vsyncadd (%p6706_p0), [#allocation3], 4294959104  ;;  %p6707_p6 = pmov %p6706_p0 }
  0x56   : > { %p6708_p9 = pmov %p6706_p0 }
  0x57   : > { %5222 = dma.done.wait (%p6707_p6), [#allocation6], 8192  }
  0x58   : > { %5224 = vsyncadd (%p6708_p9), [#allocation6], 4294959104  ;;  %p572_p10 = scmp.lt.s32.totalorder %s5373_s28, 1  ;;  %v6655_v0 = vmov 0.0   ;;  %v5250_v1 = vmov 0   ;;  %s6709_s26 = sld [smem:[#allocation36_spill]] }
  0x59   : > { %662 = vmatprep.mubr.f32.mxu0 %v6655_v0  ;;  %1137 = vmatprep.mubr.f32.mxu1 %v6655_v0  ;;  %vm591_vm0 = vcmask 1043456   ;;  %vm587_vm1 = vcmask 31744   ;;  %s6710_s0 = sld [smem:[#allocation37_spill]]  ;;  %v1061_v4 = vld [vmem:[%s6627_s3] sm:$0xf]  ;;  %v1537_v33 = vld [vmem:[#allocation2 + $0x8] sm:$0xff] }
  0x5a   : > { %s573_s1 = scalar_select %p572_p10, %s5373_s28, 1  ;;  %5101 = vset.pattern.permute.xlu0 %v5250_v1  ;;  %5102 = vset.pattern.permute.xlu1 %v5250_v1  ;;  %v1069_v8 = vsel %vm587_vm1, %v1061_v4, 0  ;;  %v1062_v9 = vld [vmem:[%s6628_s4] sm:$0xf]  ;;  %v1539_v34 = vld [vmem:[#allocation2 + $0x18] sm:$0xff]  ;;  %v1601_v35 = vld [vmem:[#allocation5 + $0x8] sm:$0xff] }
  0x5b   : > { %v5498_v12 = vand.u32 4294901760, %v1069_v8  ;;  %1065 = vperm.xlu0 %5101, %v1062_v9   ;;  %v579_v18 = vld [vmem:[%s6626_s2] sm:$0xf]  ;;  %v1603_v36 = vld [vmem:[#allocation5 + $0x18] sm:$0xff]  ;;  %v5524_v37 = vpack.c.bf16 %v1539_v34, %v1537_v33  ;;  %v1538_v40 = vld [vmem:[#allocation2 + $0x10] sm:$0xff]  ;;  %vm5252_vm6 = vmmov 0  }
  0x5c   : > { %s4498_s21 = sshll.u32 %s573_s1, 3  ;;  %v2147_v32 = vld [vmem:[%s6631_s7] sm:$0xf]  ;;  %v5526_v38 = vpack.c.bf16 %v1603_v36, %v1601_v35  ;;  %v1602_v42 = vld [vmem:[#allocation5 + $0x10] sm:$0xff]  ;;  %v1541_v43 = vld [vmem:[#allocation2 + $0x28] sm:$0xff]  ;;  %s5253_s23 = smov 16  }
  0x5d   : > { %v1139_v16 = vsub.f32 %v1069_v8, %v5498_v12  ;;  %v1536_v39 = vld [vmem:[#allocation2] sm:$0xff]  ;;  %v1543_v44 = vld [vmem:[#allocation2 + $0x38] sm:$0xff]  ;;  %v1605_v45 = vld [vmem:[#allocation5 + $0x28] sm:$0xff]  ;;  %s5254_s17 = smov 17   ;;  %s5255_s25 = smov 1   ;;  %vm3877_vm14 = vcmask 97280  }
  0x5e   : > { %s5479_s19 = scalar_lea.vmem %s6709_s26, %s4498_s21  ;;  %v1600_v41 = vld [vmem:[#allocation5] sm:$0xff]  ;;  %v1607_v46 = vld [vmem:[#allocation5 + $0x38] sm:$0xff]  ;;  %v5536_v47 = vpack.c.bf16 %v1538_v40, %v1536_v39  ;;  %v1542_v50 = vld [vmem:[#allocation2 + $0x30] sm:$0xff]  ;;  %v5540_v51 = vpack.c.bf16 %v1543_v44, %v1541_v43  ;;  %s5256_s1 = smov 15  }
  0x5f   : > { %v577_v2 = vld [vmem:[%s5479_s19] sm:$0xff]  ;;  %v1140_v20 = vand.u32 4294901760, %v1139_v16  ;;  %582 = vperm.xlu0 %5101, %v579_v18   ;;  %v5538_v48 = vpack.c.bf16 %v1602_v42, %v1600_v41  ;;  %v5542_v52 = vpack.c.bf16 %v1607_v46, %v1605_v45  ;;  %v1606_v54 = vld [vmem:[#allocation5 + $0x30] sm:$0xff]  ;;  %v1545_v55 = vld [vmem:[#allocation2 + $0x48] sm:$0xff]  ;;  %s5257_s21 = smov 113   ;;  %s5258_s29 = smov 127  }
  0x60   : > { %v578_v3 = vld [vmem:[%s6710_s0] sm:$0xf]  ;;  %v586_v5 = vcombine.high %v577_v2, %v577_v2  ;;  %v592_v6 = vsel %vm591_vm0, %v577_v2, 0  ;;  %v1547_v56 = vld [vmem:[#allocation2 + $0x58] sm:$0xff]  ;;  %v1609_v57 = vld [vmem:[#allocation5 + $0x48] sm:$0xff]  ;;  %s5259_s18 = smov 112  }
  0x61   : > { %v589_v7 = vsel %vm587_vm1, %v578_v3, 0  ;;  %v5494_v10 = vand.u32 4294901760, %v592_v6  ;;  %v1141_v24 = vsub.f32 %v1139_v16, %v1140_v20  ;;  %v1540_v49 = vld [vmem:[#allocation2 + $0x20] sm:$0xff]  ;;  %v1611_v58 = vld [vmem:[#allocation5 + $0x58] sm:$0xff]  ;;  %v1546_v62 = vld [vmem:[#allocation2 + $0x50] sm:$0xff]  ;;  %v5554_v63 = vpack.c.bf16 %v1547_v56, %v1545_v55  ;;  %s5260_s26 = smov 111  }
  0x62   : > { %v5496_v11 = vand.u32 4294901760, %v589_v7  ;;  %v594_v13 = vsel %vm591_vm0, %v586_v5, 0  ;;  %v1604_v53 = vld [vmem:[#allocation5 + $0x20] sm:$0xff]  ;;  %v5548_v59 = vpack.c.bf16 %v1542_v50, %v1540_v49  ;;  %v5556_v1 = vpack.c.bf16 %v1611_v58, %v1609_v57  ;;  %v1610_v3 = vld [vmem:[#allocation5 + $0x50] sm:$0xff]  ;;  %v1549_v4 = vld [vmem:[#allocation2 + $0x68] sm:$0xff]  ;;  %s6767_s20 = sld [smem:[#allocation38_spill]] }
  0x63   : > { %v596_v14 = vand.u32 4294901760, %v594_v13  ;;  %v681_v17 = vsub.f32 %v592_v6, %v5494_v10  ;;  %v1142_v28 = vand.u32 4294901760, %v1141_v24  ;;  %2195 = vperm.xlu0 %5101, %v2147_v32   ;;  %v5550_v60 = vpack.c.bf16 %v1606_v54, %v1604_v53  ;;  %v1544_v61 = vld [vmem:[#allocation2 + $0x40] sm:$0xff]  ;;  %v1551_v5 = vld [vmem:[#allocation2 + $0x78] sm:$0xff]  ;;  %v1613_v6 = vld [vmem:[#allocation5 + $0x68] sm:$0xff] }
  0x64   : > { %v664_v15 = vsub.f32 %v589_v7, %v5496_v11  ;;  %v1608_v2 = vld [vmem:[#allocation5 + $0x40] sm:$0xff]  ;;  %v1615_v7 = vld [vmem:[#allocation5 + $0x78] sm:$0xff]  ;;  %v5560_v8 = vpack.c.bf16 %v1546_v62, %v1544_v61  ;;  %v1617_v18 = vld [vmem:[#allocation5 + $0x88] sm:$0xff] }
  0x65   : > { %597 = vmatprep.subr.mxu0 %v596_v14  ;;  %1072 = vmatprep.subr.mxu1 %v596_v14  ;;  %v675_v21 = vsub.f32 %v594_v13, %v596_v14  ;;  %v682_v22 = vand.u32 4294901760, %v681_v17  ;;  %v5562_v9 = vpack.c.bf16 %v1610_v3, %v1608_v2  ;;  %v5568_v13 = vpack.c.bf16 %v1615_v7, %v1613_v6  ;;  %v1556_v34 = vld [vmem:[#allocation2 + $0xa0] sm:$0xff]  ;;  %v1558_v35 = vld [vmem:[#allocation2 + $0xb0] sm:$0xff]  ;;  %v1561_v42 = vld [vmem:[#allocation2 + $0xc8] sm:$0xff] }
  0x66   : > { %v665_v19 = vand.u32 4294901760, %v664_v15  ;;  %599 = vmatpush1.msra.mxu0 %v5494_v10  ;;  %1074 = vmatpush1.msra.mxu1 %v5494_v10  ;;  %v1620_v40 = vld [vmem:[#allocation5 + $0xa0] sm:$0xff]  ;;  %v1622_v41 = vld [vmem:[#allocation5 + $0xb0] sm:$0xff]  ;;  %v1563_v43 = vld [vmem:[#allocation2 + $0xd8] sm:$0xff]  ;;  %v5596_v46 = vpack.c.bf16 %v1558_v35, %v1556_v34 }
  0x67   : > { %v676_v25 = vand.u32 4294901760, %v675_v21  ;;  %v683_v26 = vsub.f32 %v681_v17, %v682_v22  ;;  %1143 = vmatmul.mubr.f32.vlgmr.msra.gmra.mrb[0].mxu1 %v1142_v28  ;;  %v1557_v28 = vld [vmem:[#allocation2 + $0xa8] sm:$0xff]  ;;  %v1627_v45 = vld [vmem:[#allocation5 + $0xd8] sm:$0xff]  ;;  %v5598_v49 = vpack.c.bf16 %v1622_v41, %v1620_v40  ;;  %v1560_v50 = vld [vmem:[#allocation2 + $0xc0] sm:$0xff]  ;;  %v5602_v54 = vpack.c.bf16 %v1563_v43, %v1561_v42 }
  0x68   : > { %v666_v23 = vsub.f32 %v664_v15, %v665_v19  ;;  %1223 = vmatprep.mubr.f32.mxu1 %v6655_v0  ;;  %v1625_v44 = vld [vmem:[#allocation5 + $0xc8] sm:$0xff]  ;;  %v1562_v53 = vld [vmem:[#allocation2 + $0xd0] sm:$0xff]  ;;  %v1624_v56 = vld [vmem:[#allocation5 + $0xc0] sm:$0xff] }
  0x69   : > { %v677_v29 = vsub.f32 %v675_v21, %v676_v25  ;;  %v684_v30 = vand.u32 4294901760, %v683_v26  ;;  %v1616_v26 = vld [vmem:[#allocation5 + $0x80] sm:$0xff]  ;;  %v5604_v55 = vpack.c.bf16 %v1627_v45, %v1625_v44  ;;  %v1626_v57 = vld [vmem:[#allocation5 + $0xd0] sm:$0xff]  ;;  %v1565_v58 = vld [vmem:[#allocation2 + $0xe8] sm:$0xff]  ;;  %v5608_v3 = vpack.c.bf16 %v1562_v53, %v1560_v50 }
  0x6a   : > { %v667_v27 = vand.u32 4294901760, %v666_v23  ;;  %v1554_v23 = vld [vmem:[#allocation2 + $0x90] sm:$0xff]  ;;  %v1567_v61 = vld [vmem:[#allocation2 + $0xf8] sm:$0xff]  ;;  %v1629_v62 = vld [vmem:[#allocation5 + $0xe8] sm:$0xff] }
  0x6b   : > { %v678_v31 = vand.u32 4294901760, %v677_v29  ;;  %v1559_v29 = vld [vmem:[#allocation2 + $0xb8] sm:$0xff]  ;;  %v1566_v6 = vld [vmem:[#allocation2 + $0xf0] sm:$0xff]  ;;  %v5614_v7 = vpack.c.bf16 %v1567_v61, %v1565_v58  ;;  %v1637_v35 = vld [vmem:[#allocation5 + $0x128] sm:$0xff] }
  0x6c   : > { %668 = vmatmul.mubr.f32.vlgmr.msra.gmra.mrb[0].mxu0 %v667_v27  ;;  %v1618_v27 = vld [vmem:[#allocation5 + $0x90] sm:$0xff]  ;;  %v5590_v36 = vpack.c.bf16 %v1559_v29, %v1557_v28  ;;  %v1631_v2 = vld [vmem:[#allocation5 + $0xf8] sm:$0xff]  ;;  %v1632_v29 = vld [vmem:[#allocation5 + $0x100] sm:$0xff] }
  0x6d   : > { %748 = vmatprep.mubr.f32.mxu0 %v6655_v0  ;;  %679 = vmatprep.subr.mxu0 %v678_v31  ;;  %v5586_v33 = vpack.c.bf16 %v1618_v27, %v1616_v26  ;;  %v1570_v26 = vld [vmem:[#allocation2 + $0x110] sm:$0xff]  ;;  %v1575_v34 = vld [vmem:[#allocation2 + $0x138] sm:$0xff]  ;;  %v1572_v43 = vld [vmem:[#allocation2 + $0x120] sm:$0xff] }
  0x6e   : > { %1154 = vmatprep.subr.mxu1 %v678_v31  ;;  %685 = vmatpush1.msra.mxu0 %v684_v30  ;;  %v1623_v31 = vld [vmem:[#allocation5 + $0xb8] sm:$0xff]  ;;  %v1574_v44 = vld [vmem:[#allocation2 + $0x130] sm:$0xff]  ;;  %v1636_v53 = vld [vmem:[#allocation5 + $0x120] sm:$0xff] }
  0x6f   : > { %1160 = vmatpush1.msra.mxu1 %v684_v30  ;;  %758 = vmatprep.subr.mxu0 %v675_v21  ;;  %v1621_v30 = vld [vmem:[#allocation5 + $0xa8] sm:$0xff]  ;;  %v1639_v40 = vld [vmem:[#allocation5 + $0x138] sm:$0xff] }
  0x70   : > { %1233 = vmatprep.subr.mxu1 %v675_v21  ;;  %1225 = vmatmul.mubr.f32.vlgmr.msra.gmra.mrb[0].mxu1 %v5498_v12  ;;  %v5592_v39 = vpack.c.bf16 %v1623_v31, %v1621_v30  ;;  %v1634_v30 = vld [vmem:[#allocation5 + $0x110] sm:$0xff]  ;;  %v1573_v31 = vld [vmem:[#allocation2 + $0x128] sm:$0xff]  ;;  %v5640_v50 = vpack.c.bf16 %v1639_v40, %v1637_v35  ;;  %v1579_v58 = vld [vmem:[#allocation2 + $0x158] sm:$0xff] }
  0x71   : > { %1236 = vmatpush1.msra.mxu1 %v681_v17  ;;  %1299 = vmatprep.mubr.f32.mxu1 %v6655_v0  ;;  %v5634_v42 = vpack.c.bf16 %v1634_v30, %v1632_v29  ;;  %v5638_v45 = vpack.c.bf16 %v1575_v34, %v1573_v31  ;;  %v1641_v61 = vld [vmem:[#allocation5 + $0x148] sm:$0xff]  ;;  %v1647_v29 = vld [vmem:[#allocation5 + $0x178] sm:$0xff]  ;;  %v1580_v34 = vld [vmem:[#allocation2 + $0x160] sm:$0xff] }
  0x72   : > { %1309 = vmatprep.subr.mxu1 %v596_v14  ;;  %v1582_v35 = vld [vmem:[#allocation2 + $0x170] sm:$0xff] }
  0x74   : > { %750 = vmatmul.mubr.f32.vlgmr.msra.gmra.mrb[0].mxu0 %v5496_v11 }
  0x75   : > { %761 = vmatpush1.msra.mxu0 %v681_v17  ;;  %824 = vmatprep.mubr.f32.mxu0 %v6655_v0  ;;  %v1555_v17 = vld [vmem:[#allocation2 + $0x98] sm:$0xff] }
  0x76   : > { %834 = vmatprep.subr.mxu0 %v596_v14 }
  0x78   : > { %1302 = vmatmul.mubr.f32.vlgmr.msra.gmra.mrb[0].mxu1 %v1139_v16  ;;  %v1553_v16 = vld [vmem:[#allocation2 + $0x88] sm:$0xff] }
  0x79   : > { %1311 = vmatpush1.msra.mxu1 %v5494_v10  ;;  %1374 = vmatprep.mubr.f32.mxu1 %v6655_v0  ;;  %v5578_v24 = vpack.c.bf16 %v1555_v17, %v1553_v16  ;;  %v1571_v16 = vld [vmem:[#allocation2 + $0x118] sm:$0xff]  ;;  %v1633_v17 = vld [vmem:[#allocation5 + $0x108] sm:$0xff] }
  0x7a   : > { %1387 = vmatprep.subr.mxu1 %v676_v25 }
  0x7c   : > { %827 = vmatmul.mubr.f32.vlgmr.msra.gmra.mrb[0].mxu0 %v664_v15  ;;  %v1614_v15 = vld [vmem:[#allocation5 + $0x70] sm:$0xff] }
  0x7d   : > { %836 = vmatpush1.msra.mxu0 %v5494_v10  ;;  %899 = vmatprep.mubr.f32.mxu0 %v6655_v0 }
  0x7e   : > { %912 = vmatprep.subr.mxu0 %v676_v25 }
  0x80   : > { %1378 = vmatmul.mubr.f32.vlgmr.msra.gmra.mrb[0].mxu1 %v1140_v20 }
  0x81   : > { %1391 = vmatpush1.msra.mxu1 %v682_v22  ;;  %1454 = vmatprep.mubr.f32.mxu1 %v6655_v0 }
  0x82   : > { %1463 = vmatprep.subr.mxu1 %v596_v14 }
  0x84   : > { %903 = vmatmul.mubr.f32.vlgmr.msra.gmra.mrb[0].mxu0 %v665_v19  ;;  %v1619_v19 = vld [vmem:[#allocation5 + $0x98] sm:$0xff] }
  0x85   : > { %916 = vmatpush1.msra.mxu0 %v682_v22  ;;  %979 = vmatprep.mubr.f32.mxu0 %v6655_v0  ;;  %v1552_v22 = vld [vmem:[#allocation2 + $0x80] sm:$0xff]  ;;  %v5580_v25 = vpack.c.bf16 %v1619_v19, %v1617_v18  ;;  %v1635_v18 = vld [vmem:[#allocation5 + $0x118] sm:$0xff] }
  0x86   : > { %988 = vmatprep.subr.mxu0 %v596_v14  ;;  %v1612_v14 = vld [vmem:[#allocation5 + $0x60] sm:$0xff]  ;;  %v5584_v32 = vpack.c.bf16 %v1554_v23, %v1552_v22  ;;  %v5628_v28 = vpack.c.bf16 %v1635_v18, %v1633_v17  ;;  %v1642_v17 = vld [vmem:[#allocation5 + $0x150] sm:$0xff]  ;;  %v1581_v18 = vld [vmem:[#allocation2 + $0x168] sm:$0xff] }
  0x87   : > { %v5574_v21 = vpack.c.bf16 %v1614_v15, %v1612_v14  ;;  %v1630_v14 = vld [vmem:[#allocation5 + $0xf0] sm:$0xff]  ;;  %v1569_v15 = vld [vmem:[#allocation2 + $0x108] sm:$0xff]  ;;  %v1568_v23 = vld [vmem:[#allocation2 + $0x100] sm:$0xff] }
  0x88   : > { %1456 = vmatmul.mubr.f32.vlgmr.msra.gmra.mrb[0].mxu1 %v5498_v12  ;;  %v5626_v27 = vpack.c.bf16 %v1571_v16, %v1569_v15  ;;  %v5632_v41 = vpack.c.bf16 %v1570_v26, %v1568_v23  ;;  %v1640_v16 = vld [vmem:[#allocation5 + $0x140] sm:$0xff]  ;;  %v1583_v23 = vld [vmem:[#allocation2 + $0x178] sm:$0xff]  ;;  %v1645_v26 = vld [vmem:[#allocation5 + $0x168] sm:$0xff] }
  0x89   : > { %1465 = vmatpush1.msra.mxu1 %v5494_v10  ;;  %1528 = vmatprep.mubr.f32.mxu1 %v6655_v0  ;;  %v5658_v31 = vpack.c.bf16 %v1642_v17, %v1640_v16  ;;  %v5662_v40 = vpack.c.bf16 %v1583_v23, %v1581_v18  ;;  %v1586_v16 = vld [vmem:[#allocation2 + $0x190] sm:$0xff]  ;;  %v1648_v23 = vld [vmem:[#allocation5 + $0x180] sm:$0xff] }
  0x8a   : > { %4607 = vmatprep.subr.bf16.mxu1 %v5526_v38 }
  0x8b   : > { %6712 = vst [vmem:[#allocation20_spill] sm:$0xff] %v5658_v31  ;;  %6713 = vst [vmem:[#allocation21_spill] sm:$0xff] %v5662_v40 }
  0x8c   : > { %981 = vmatmul.mubr.f32.vlgmr.msra.gmra.mrb[0].mxu0 %v5496_v11 }
  0x8d   : > { %990 = vmatpush1.msra.mxu0 %v5494_v10  ;;  %1053 = vmatprep.mubr.f32.mxu0 %v6655_v0  ;;  %v1548_v10 = vld [vmem:[#allocation2 + $0x60] sm:$0xff]  ;;  %v1591_v0 = vld [vmem:[#allocation2 + $0x1b8] sm:$0xff] }
  0x8e   : > { %4543 = vmatprep.subr.bf16.mxu0 %v5524_v37 }
  0x90   : > { %1530 = vmatmul.mubr.f32.vlgmr.msra.gmra.mrb[0].mxu1 %v5498_v12  ;;  %v5566_v12 = vpack.c.bf16 %v1551_v5, %v1549_v4  ;;  %v5610_v4 = vpack.c.bf16 %v1626_v57, %v1624_v56  ;;  %v1564_v5 = vld [vmem:[#allocation2 + $0xe0] sm:$0xff]  ;;  %v1638_v56 = vld [vmem:[#allocation5 + $0x130] sm:$0xff]  ;;  %v1577_v57 = vld [vmem:[#allocation2 + $0x148] sm:$0xff] }
  0x91   : > { %4609 = vmatpush1.bf16.msra.mxu1 %v5538_v48  ;;  %v5620_v19 = vpack.c.bf16 %v1566_v6, %v1564_v5  ;;  %v5646_v5 = vpack.c.bf16 %v1638_v56, %v1636_v53  ;;  %v1576_v6 = vld [vmem:[#allocation2 + $0x140] sm:$0xff]  ;;  %v1646_v53 = vld [vmem:[#allocation5 + $0x170] sm:$0xff]  ;;  %v1585_v56 = vld [vmem:[#allocation2 + $0x188] sm:$0xff] }
  0x92   : > { %4611 = vmatprep.subr.bf16.mxu1 %v5542_v52 }
  0x94   : > { %1055 = vmatmul.mubr.f32.vlgmr.msra.gmra.mrb[0].mxu0 %v5496_v11  ;;  %v1550_v11 = vld [vmem:[#allocation2 + $0x70] sm:$0xff] }
  0x95   : > { %4545 = vmatpush1.bf16.msra.mxu0 %v5536_v47  ;;  %4613 = vmatpush1.bf16.msra.mxu1 %v5550_v60  ;;  %v5572_v20 = vpack.c.bf16 %v1550_v11, %v1548_v10  ;;  %v5616_v10 = vpack.c.bf16 %v1631_v2, %v1629_v62  ;;  %v1628_v11 = vld [vmem:[#allocation5 + $0xe0] sm:$0xff]  ;;  %v1643_v62 = vld [vmem:[#allocation5 + $0x158] sm:$0xff]  ;;  %v5644_v2 = vpack.c.bf16 %v1574_v44, %v1572_v43 }
  0x96   : > { %4547 = vmatprep.subr.bf16.mxu0 %v5540_v51  ;;  %4615 = vmatprep.subr.bf16.mxu1 %v5556_v1  ;;  %v5622_v22 = vpack.c.bf16 %v1630_v14, %v1628_v11  ;;  %v1578_v11 = vld [vmem:[#allocation2 + $0x150] sm:$0xff]  ;;  %v5650_v14 = vpack.c.bf16 %v1579_v58, %v1577_v57  ;;  %v5652_v15 = vpack.c.bf16 %v1643_v62, %v1641_v61  ;;  %v1644_v44 = vld [vmem:[#allocation5 + $0x160] sm:$0xff]  ;;  %v1587_v57 = vld [vmem:[#allocation2 + $0x198] sm:$0xff] }
  0x97   : > { %v5656_v30 = vpack.c.bf16 %v1578_v11, %v1576_v6  ;;  %v5664_v43 = vpack.c.bf16 %v1647_v29, %v1645_v26  ;;  %v1649_v58 = vld [vmem:[#allocation5 + $0x188] sm:$0xff]  ;;  %v1651_v61 = vld [vmem:[#allocation5 + $0x198] sm:$0xff]  ;;  %v5668_v62 = vpack.c.bf16 %v1582_v35, %v1580_v34  ;;  %v5670_v6 = vpack.c.bf16 %v1646_v53, %v1644_v44  ;;  %v1584_v11 = vld [vmem:[#allocation2 + $0x180] sm:$0xff] }
  0x98   : > { %v5674_v17 = vpack.c.bf16 %v1587_v57, %v1585_v56  ;;  %v5676_v18 = vpack.c.bf16 %v1651_v61, %v1649_v58  ;;  %v1650_v26 = vld [vmem:[#allocation5 + $0x190] sm:$0xff]  ;;  %v1589_v29 = vld [vmem:[#allocation2 + $0x1a8] sm:$0xff]  ;;  %v5680_v34 = vpack.c.bf16 %v1586_v16, %v1584_v11  ;;  %v1588_v44 = vld [vmem:[#allocation2 + $0x1a0] sm:$0xff] }
  0x99   : > { %4549 = vmatpush1.bf16.msra.mxu0 %v5548_v59  ;;  %4617 = vmatpush1.bf16.msra.mxu1 %v5562_v9  ;;  %6711 = vst [vmem:[#allocation19_spill] sm:$0xff] %v5656_v30  ;;  %6714 = vst [vmem:[#allocation22_spill] sm:$0xff] %v5664_v43  ;;  %v5682_v35 = vpack.c.bf16 %v1650_v26, %v1648_v23  ;;  %v1590_v53 = vld [vmem:[#allocation2 + $0x1b0] sm:$0xff]  ;;  %v5686_v56 = vpack.c.bf16 %v1591_v0, %v1589_v29  ;;  %v1652_v58 = vld [vmem:[#allocation5 + $0x1a0] sm:$0xff] }
  0x9a   : > { %4551 = vmatprep.subr.bf16.mxu0 %v5554_v63  ;;  %4619 = vmatprep.subr.bf16.mxu1 %v5568_v13  ;;  %6715 = vst [vmem:[#allocation23_spill] sm:$0xff] %v5668_v62  ;;  %6716 = vst [vmem:[#allocation24_spill] sm:$0xff] %v5670_v6  ;;  %v1654_v61 = vld [vmem:[#allocation5 + $0x1b0] sm:$0xff]  ;;  %v5692_v11 = vpack.c.bf16 %v1590_v53, %v1588_v44  ;;  %v1592_v23 = vld [vmem:[#allocation2 + $0x1c0] sm:$0xff] }
  0x9b   : > { %v5694_v16 = vpack.c.bf16 %v1654_v61, %v1652_v58  ;;  %v1656_v26 = vld [vmem:[#allocation5 + $0x1c0] sm:$0xff]  ;;  %v1658_v29 = vld [vmem:[#allocation5 + $0x1d0] sm:$0xff]  ;;  %v1663_v58 = vld [vmem:[#allocation5 + $0x1f8] sm:$0xff] }
  0x9c   : > { %6718 = vst [vmem:[#allocation26_spill] sm:$0xff] %v5692_v11  ;;  %v5706_v53 = vpack.c.bf16 %v1658_v29, %v1656_v26  ;;  %v1596_v61 = vld [vmem:[#allocation2 + $0x1e0] sm:$0xff]  ;;  %v1662_v29 = vld [vmem:[#allocation5 + $0x1f0] sm:$0xff] }
  0x9d   : > { %4553 = vmatpush1.bf16.msra.mxu0 %v5560_v8  ;;  %4621 = vmatpush1.bf16.msra.mxu1 %v5574_v21  ;;  %6719 = vst [vmem:[#allocation27_spill] sm:$0xff] %v5694_v16  ;;  %v1660_v26 = vld [vmem:[#allocation5 + $0x1e0] sm:$0xff] }
  0x9e   : > { %4555 = vmatprep.subr.bf16.mxu0 %v5566_v12  ;;  %4623 = vmatprep.subr.bf16.mxu1 %v5580_v25  ;;  %6723 = vst [vmem:[#allocation31_spill] sm:$0xff] %v5706_v53 }
  0xa1   : > { %4557 = vmatpush1.bf16.msra.mxu0 %v5572_v20  ;;  %4625 = vmatpush1.bf16.msra.mxu1 %v5586_v33 }
  0xa2   : > { %4559 = vmatprep.subr.bf16.mxu0 %v5578_v24  ;;  %4627 = vmatprep.subr.bf16.mxu1 %v5592_v39 }
  0xa5   : > { %4561 = vmatpush1.bf16.msra.mxu0 %v5584_v32  ;;  %4629 = vmatpush1.bf16.msra.mxu1 %v5598_v49 }
  0xa6   : > { %4563 = vmatprep.subr.bf16.mxu0 %v5590_v36  ;;  %4631 = vmatprep.subr.bf16.mxu1 %v5604_v55 }
  0xa9   : > { %4565 = vmatpush1.bf16.msra.mxu0 %v5596_v46  ;;  %4633 = vmatpush1.bf16.msra.mxu1 %v5610_v4 }
  0xaa   : > { %4567 = vmatprep.subr.bf16.mxu0 %v5602_v54  ;;  %4635 = vmatprep.subr.bf16.mxu1 %v5616_v10 }
  0xad   : > { %4569 = vmatpush1.bf16.msra.mxu0 %v5608_v3  ;;  %4637 = vmatpush1.bf16.msra.mxu1 %v5622_v22 }
  0xae   : > { %4571 = vmatprep.subr.bf16.mxu0 %v5614_v7  ;;  %4639 = vmatprep.subr.bf16.mxu1 %v5628_v28 }
  0xb1   : > { %4573 = vmatpush1.bf16.msra.mxu0 %v5620_v19  ;;  %4641 = vmatpush1.bf16.msra.mxu1 %v5634_v42 }
  0xb2   : > { %4575 = vmatprep.subr.bf16.mxu0 %v5626_v27  ;;  %4643 = vmatprep.subr.bf16.mxu1 %v5640_v50 }
  0xb5   : > { %4577 = vmatpush1.bf16.msra.mxu0 %v5632_v41  ;;  %4645 = vmatpush1.bf16.msra.mxu1 %v5646_v5 }
  0xb6   : > { %4579 = vmatprep.subr.bf16.mxu0 %v5638_v45  ;;  %4647 = vmatprep.subr.bf16.mxu1 %v5652_v15 }
  0xb9   : > { %4581 = vmatpush1.bf16.msra.mxu0 %v5644_v2  ;;  %4649 = vmatpush1.bf16.msra.mxu1 %v5658_v31  ;;  %v1655_v31 = vld [vmem:[#allocation5 + $0x1b8] sm:$0xff] }
  0xba   : > { %4583 = vmatprep.subr.bf16.mxu0 %v5650_v14  ;;  %4651 = vmatprep.subr.bf16.mxu1 %v5664_v43  ;;  %v1657_v43 = vld [vmem:[#allocation5 + $0x1c8] sm:$0xff] }
  0xbd   : > { %4585 = vmatpush1.bf16.msra.mxu0 %v5656_v30  ;;  %v1653_v30 = vld [vmem:[#allocation5 + $0x1a8] sm:$0xff]  ;;  %4653 = vmatpush1.bf16.msra.mxu1 %v5670_v6  ;;  %v1659_v6 = vld [vmem:[#allocation5 + $0x1d8] sm:$0xff] }
  0xbe   : > { %4587 = vmatprep.subr.bf16.mxu0 %v5662_v40  ;;  %4655 = vmatprep.subr.bf16.mxu1 %v5676_v18  ;;  %v5688_v57 = vpack.c.bf16 %v1655_v31, %v1653_v30  ;;  %v1593_v40 = vld [vmem:[#allocation2 + $0x1c8] sm:$0xff]  ;;  %v5700_v30 = vpack.c.bf16 %v1659_v6, %v1657_v43  ;;  %v1594_v31 = vld [vmem:[#allocation2 + $0x1d0] sm:$0xff]  ;;  %v1599_v43 = vld [vmem:[#allocation2 + $0x1f8] sm:$0xff] }
  0xbf   : > { %v5704_v44 = vpack.c.bf16 %v1594_v31, %v1592_v23 }
  0xc0   : > { %6717 = vst [vmem:[#allocation25_spill] sm:$0xff] %v5688_v57  ;;  %6721 = vst [vmem:[#allocation29_spill] sm:$0xff] %v5700_v30 }
  0xc1   : > { %4589 = vmatpush1.bf16.msra.mxu0 %v5668_v62  ;;  %v1595_v62 = vld [vmem:[#allocation2 + $0x1d8] sm:$0xff]  ;;  %4657 = vmatpush1.bf16.msra.mxu1 %v5682_v35  ;;  %6722 = vst [vmem:[#allocation30_spill] sm:$0xff] %v5704_v44 }
  0xc2   : > { %4591 = vmatprep.subr.bf16.mxu0 %v5674_v17  ;;  %4659 = vmatprep.subr.bf16.mxu1 %v5688_v57  ;;  %v5698_v0 = vpack.c.bf16 %v1595_v62, %v1593_v40  ;;  %v1597_v40 = vld [vmem:[#allocation2 + $0x1e8] sm:$0xff] }
  0xc3   : > { %v1661_v62 = vld [vmem:[#allocation5 + $0x1e8] sm:$0xff]  ;;  %v5712_v6 = vpack.c.bf16 %v1599_v43, %v1597_v40 }
  0xc4   : > { %6720 = vst [vmem:[#allocation28_spill] sm:$0xff] %v5698_v0  ;;  %v5714_v23 = vpack.c.bf16 %v1663_v58, %v1661_v62 }
  0xc5   : > { %4593 = vmatpush1.bf16.msra.mxu0 %v5680_v34  ;;  %4661 = vmatpush1.bf16.msra.mxu1 %v5694_v16  ;;  %6724 = vst [vmem:[#allocation32_spill] sm:$0xff] %v5712_v6 }
  0xc6   : > { %4595 = vmatprep.subr.bf16.mxu0 %v5686_v56  ;;  %4663 = vmatprep.subr.bf16.mxu1 %v5700_v30  ;;  %6725 = vst [vmem:[#allocation33_spill] sm:$0xff] %v5714_v23 }
  0xc9   : > { %4597 = vmatpush1.bf16.msra.mxu0 %v5692_v11  ;;  %4665 = vmatpush1.bf16.msra.mxu1 %v5706_v53  ;;  %v1598_v11 = vld [vmem:[#allocation2 + $0x1f0] sm:$0xff] }
  0xca   : > { %4599 = vmatprep.subr.bf16.mxu0 %v5698_v0  ;;  %v5716_v31 = vpack.c.bf16 %v1598_v11, %v1596_v61  ;;  %v5719_v0 = vpack.c.bf16 %v1662_v29, %v1660_v26  ;;  %4667 = vmatprep.subr.bf16.mxu1 %v5714_v23  ;;  %v6728_v29 = vld [vmem:[#allocation20_spill] sm:$0xff] }
  0xcc   : > { %6726 = vst [vmem:[#allocation34_spill] sm:$0xff] %v5716_v31  ;;  %6727 = vst [vmem:[#allocation35_spill] sm:$0xff] %v5719_v0 }
  0xcd   : > { %4601 = vmatpush1.bf16.msra.mxu0 %v5704_v44  ;;  %4669 = vmatpush1.bf16.msra.mxu1 %v5719_v0 }
  0xce   : > { %4603 = vmatprep.subr.bf16.mxu0 %v5712_v6  ;;  %4799 = vmatprep.subr.bf16.mxu1 %v5524_v37 }
  0xd1   : > { %4605 = vmatpush1.bf16.msra.mxu0 %v5716_v31 }
  0xd2   : > { %4671 = vmatprep.subr.bf16.mxu0 %v5526_v38 }
  0xda   : > { %v1066_v40 = vpop.permute.xlu0 %1065 }
 0x163   : > { %v1531_v11 = vpop.f32.mrb[0].mxu1 }
 0x164   : > { %v1533_v58 = vpop.f32.mrb[1].mxu1  ;;  %v4952_v26 = vadd.f32 %v1531_v11, %v1066_v40  ;;  %v6730_v11 = vld [vmem:[#allocation22_spill] sm:$0xff] }
 0x165   : > { %v4953_v61 = vadd.f32 %v1533_v58, %v1066_v40  ;;  %v6729_v40 = vld [vmem:[#allocation19_spill] sm:$0xff]  ;;  %v6731_v58 = vld [vmem:[#allocation21_spill] sm:$0xff] }
 0x167   : > { %v5726_v43 = vpop.f32.mrb[0].mxu0  ;;  %1728 = vmatprep.mubr.f32.mxu0 %v4953_v61  ;;  %1799 = vmatprep.mubr.f32.mxu1 %v4953_v61  ;;  %v6732_v61 = vld [vmem:[#allocation24_spill] sm:$0xff] }
 0x168   : > { %v5728_v62 = vpop.f32.mrb[1].mxu0  ;;  %1729 = vmatmul.mubr.f32.vlgmr.msra.gmra.mrb[2].mxu0 %v4952_v26  ;;  %1800 = vmatmul.mubr.f32.vlgmr.msra.gmra.mrb[2].mxu1 %v4952_v26  ;;  %v6733_v26 = vld [vmem:[#allocation23_spill] sm:$0xff] }
 0x169   : > { %4673 = vmatpush1.bf16.msra.mxu0 %v5538_v48  ;;  %4801 = vmatpush1.bf16.msra.mxu1 %v5536_v47 }
 0x16a   : > { %4675 = vmatprep.subr.bf16.mxu0 %v5542_v52  ;;  %4803 = vmatprep.subr.bf16.mxu1 %v5540_v51 }
 0x16d   : > { %4677 = vmatpush1.bf16.msra.mxu0 %v5550_v60  ;;  %4805 = vmatpush1.bf16.msra.mxu1 %v5548_v59 }
 0x16e   : > { %4679 = vmatprep.subr.bf16.mxu0 %v5556_v1  ;;  %4807 = vmatprep.subr.bf16.mxu1 %v5554_v63 }
 0x171   : > { %4681 = vmatpush1.bf16.msra.mxu0 %v5562_v9  ;;  %4809 = vmatpush1.bf16.msra.mxu1 %v5560_v8 }
 0x172   : > { %4683 = vmatprep.subr.bf16.mxu0 %v5568_v13  ;;  %4811 = vmatprep.subr.bf16.mxu1 %v5566_v12 }
 0x175   : > { %4685 = vmatpush1.bf16.msra.mxu0 %v5574_v21  ;;  %4813 = vmatpush1.bf16.msra.mxu1 %v5572_v20 }
 0x176   : > { %4687 = vmatprep.subr.bf16.mxu0 %v5580_v25  ;;  %4815 = vmatprep.subr.bf16.mxu1 %v5578_v24 }
 0x179   : > { %4689 = vmatpush1.bf16.msra.mxu0 %v5586_v33  ;;  %4817 = vmatpush1.bf16.msra.mxu1 %v5584_v32 }
 0x17a   : > { %4691 = vmatprep.subr.bf16.mxu0 %v5592_v39  ;;  %4819 = vmatprep.subr.bf16.mxu1 %v5590_v36 }
 0x17d   : > { %4693 = vmatpush1.bf16.msra.mxu0 %v5598_v49  ;;  %4821 = vmatpush1.bf16.msra.mxu1 %v5596_v46 }
 0x17e   : > { %4695 = vmatprep.subr.bf16.mxu0 %v5604_v55  ;;  %4823 = vmatprep.subr.bf16.mxu1 %v5602_v54 }
 0x181   : > { %4697 = vmatpush1.bf16.msra.mxu0 %v5610_v4  ;;  %4825 = vmatpush1.bf16.msra.mxu1 %v5608_v3 }
 0x182   : > { %4699 = vmatprep.subr.bf16.mxu0 %v5616_v10  ;;  %4827 = vmatprep.subr.bf16.mxu1 %v5614_v7 }
 0x185   : > { %4701 = vmatpush1.bf16.msra.mxu0 %v5622_v22  ;;  %4829 = vmatpush1.bf16.msra.mxu1 %v5620_v19 }
 0x186   : > { %4703 = vmatprep.subr.bf16.mxu0 %v5628_v28  ;;  %4831 = vmatprep.subr.bf16.mxu1 %v5626_v27 }
 0x189   : > { %4705 = vmatpush1.bf16.msra.mxu0 %v5634_v42  ;;  %4833 = vmatpush1.bf16.msra.mxu1 %v5632_v41 }
 0x18a   : > { %4707 = vmatprep.subr.bf16.mxu0 %v5640_v50  ;;  %4835 = vmatprep.subr.bf16.mxu1 %v5638_v45 }
 0x18d   : > { %4709 = vmatpush1.bf16.msra.mxu0 %v5646_v5  ;;  %4837 = vmatpush1.bf16.msra.mxu1 %v5644_v2 }
 0x18e   : > { %4711 = vmatprep.subr.bf16.mxu0 %v5652_v15  ;;  %4839 = vmatprep.subr.bf16.mxu1 %v5650_v14 }
 0x191   : > { %4713 = vmatpush1.bf16.msra.mxu0 %v6728_v29  ;;  %4841 = vmatpush1.bf16.msra.mxu1 %v6729_v40 }
 0x192   : > { %4715 = vmatprep.subr.bf16.mxu0 %v6730_v11  ;;  %4843 = vmatprep.subr.bf16.mxu1 %v6731_v58  ;;  %v6734_v11 = vld [vmem:[#allocation26_spill] sm:$0xff] }
 0x195   : > { %4717 = vmatpush1.bf16.msra.mxu0 %v6732_v61  ;;  %4845 = vmatpush1.bf16.msra.mxu1 %v6733_v26  ;;  %v6735_v61 = vld [vmem:[#allocation28_spill] sm:$0xff] }
 0x196   : > { %4719 = vmatprep.subr.bf16.mxu0 %v5676_v18  ;;  %4847 = vmatprep.subr.bf16.mxu1 %v5674_v17 }
 0x199   : > { %4721 = vmatpush1.bf16.msra.mxu0 %v5682_v35  ;;  %4849 = vmatpush1.bf16.msra.mxu1 %v5680_v34 }
 0x19a   : > { %4723 = vmatprep.subr.bf16.mxu0 %v5688_v57  ;;  %4851 = vmatprep.subr.bf16.mxu1 %v5686_v56 }
 0x19d   : > { %4725 = vmatpush1.bf16.msra.mxu0 %v5694_v16  ;;  %4853 = vmatpush1.bf16.msra.mxu1 %v6734_v11 }
 0x19e   : > { %4727 = vmatprep.subr.bf16.mxu0 %v5700_v30  ;;  %4855 = vmatprep.subr.bf16.mxu1 %v6735_v61  ;;  %v2128_v30 = vld [vmem:[%s6630_s6] sm:$0xf] }
 0x19f   : > { %2131 = vperm.xlu1 %5102, %v2128_v30  }
 0x1a1   : > { %4729 = vmatpush1.bf16.msra.mxu0 %v5706_v53  ;;  %4857 = vmatpush1.bf16.msra.mxu1 %v5704_v44  ;;  %v2120_v53 = vld [vmem:[%s6629_s5] sm:$0xf] }
 0x1a2   : > { %4731 = vmatprep.subr.bf16.mxu0 %v5714_v23  ;;  %4859 = vmatprep.subr.bf16.mxu1 %v5712_v6  ;;  %v583_v23 = vpop.permute.xlu0 %582 }
 0x1a3   : > { %2123 = vperm.xlu1 %5102, %v2120_v53   ;;  %v4950_v6 = vadd.f32 %v5726_v43, %v583_v23 }
 0x1a5   : > { %4733 = vmatpush1.bf16.msra.mxu0 %v5719_v0  ;;  %4861 = vmatpush1.bf16.msra.mxu1 %v5716_v31  ;;  %v4951_v0 = vadd.f32 %v5728_v62, %v583_v23 }
 0x1a6   : > { %4735 = vmatprep.subr.bf16.mxu0 %v5524_v37  ;;  %4863 = vmatprep.subr.bf16.mxu1 %v5526_v38 }
 0x23b   : > { %v1730_v31 = vpop.f32.mrb[2].mxu0  ;;  %v1801_v44 = vpop.f32.mrb[2].mxu1 }
 0x23c   : > { %v5802_v37 = vmul.f32 %v4950_v6, %v1730_v31  ;;  %v1808_v38 = vmul.f32 %v4950_v6, %v1801_v44  ;;  %v1732_v61 = vpop.f32.mrb[3].mxu0  ;;  %v1803_v16 = vpop.f32.mrb[3].mxu1 }
 0x23d   : > { %v1807_v11 = vmul.f32 %v4951_v0, %v1732_v61  ;;  %v1809_v57 = vmul.f32 %v4951_v0, %v1803_v16 }
 0x23f   : > { %1874 = vmatprep.mubr.f32.mxu0 %v1809_v57  ;;  %2018 = vmatprep.mubr.f32.mxu1 %v1809_v57 }
 0x240   : > { %1875 = vmatmul.mubr.f32.vlgmr.msra.gmra.mrb[4].mxu0 %v1808_v38  ;;  %2019 = vmatmul.mubr.f32.vlgmr.msra.gmra.mrb[4].mxu1 %v1808_v38 }
 0x241   : > { %4737 = vmatpush1.bf16.msra.mxu0 %v5536_v47  ;;  %4865 = vmatpush1.bf16.msra.mxu1 %v5538_v48  ;;  %v6736_v47 = vld [vmem:[#allocation22_spill] sm:$0xff]  ;;  %v6737_v48 = vld [vmem:[#allocation24_spill] sm:$0xff] }
 0x242   : > { %1945 = vmatprep.mubr.f32.mxu0 %v1807_v11  ;;  %2089 = vmatprep.mubr.f32.mxu1 %v1807_v11 }
 0x243   : > { %4739 = vmatprep.subr.bf16.mxu0 %v5540_v51  ;;  %4867 = vmatprep.subr.bf16.mxu1 %v5542_v52  ;;  %v6738_v51 = vld [vmem:[#allocation25_spill] sm:$0xff]  ;;  %v6739_v52 = vld [vmem:[#allocation26_spill] sm:$0xff] }
 0x245   : > { %4741 = vmatpush1.bf16.msra.mxu0 %v5548_v59  ;;  %4869 = vmatpush1.bf16.msra.mxu1 %v5550_v60  ;;  %v6740_v59 = vld [vmem:[#allocation27_spill] sm:$0xff]  ;;  %v6741_v60 = vld [vmem:[#allocation28_spill] sm:$0xff] }
 0x246   : > { %4743 = vmatprep.subr.bf16.mxu0 %v5554_v63  ;;  %4871 = vmatprep.subr.bf16.mxu1 %v5556_v1  ;;  %v6742_v63 = vld [vmem:[#allocation29_spill] sm:$0xff]  ;;  %v6743_v1 = vld [vmem:[#allocation30_spill] sm:$0xff] }
 0x249   : > { %4745 = vmatpush1.bf16.msra.mxu0 %v5560_v8  ;;  %4873 = vmatpush1.bf16.msra.mxu1 %v5562_v9  ;;  %v6744_v8 = vld [vmem:[#allocation31_spill] sm:$0xff]  ;;  %v6745_v9 = vld [vmem:[#allocation32_spill] sm:$0xff] }
 0x24a   : > { %4747 = vmatprep.subr.bf16.mxu0 %v5566_v12  ;;  %4875 = vmatprep.subr.bf16.mxu1 %v5568_v13  ;;  %v6746_v12 = vld [vmem:[#allocation33_spill] sm:$0xff]  ;;  %v6747_v13 = vld [vmem:[#allocation34_spill] sm:$0xff] }
 0x24d   : > { %4749 = vmatpush1.bf16.msra.mxu0 %v5572_v20  ;;  %4877 = vmatpush1.bf16.msra.mxu1 %v5574_v21  ;;  %v6748_v20 = vld [vmem:[#allocation35_spill] sm:$0xff]  ;;  %v6749_v21 = vmov 0.0  }
 0x24e   : > { %4751 = vmatprep.subr.bf16.mxu0 %v5578_v24  ;;  %4879 = vmatprep.subr.bf16.mxu1 %v5580_v25 }
 0x251   : > { %4753 = vmatpush1.bf16.msra.mxu0 %v5584_v32  ;;  %4881 = vmatpush1.bf16.msra.mxu1 %v5586_v33 }
 0x252   : > { %4755 = vmatprep.subr.bf16.mxu0 %v5590_v36  ;;  %4883 = vmatprep.subr.bf16.mxu1 %v5592_v39 }
 0x255   : > { %4757 = vmatpush1.bf16.msra.mxu0 %v5596_v46  ;;  %4885 = vmatpush1.bf16.msra.mxu1 %v5598_v49 }
 0x256   : > { %4759 = vmatprep.subr.bf16.mxu0 %v5602_v54  ;;  %4887 = vmatprep.subr.bf16.mxu1 %v5604_v55 }
 0x259   : > { %4761 = vmatpush1.bf16.msra.mxu0 %v5608_v3  ;;  %4889 = vmatpush1.bf16.msra.mxu1 %v5610_v4  ;;  %v5251_v4 = vmov 839922192  }
 0x25a   : > { %4763 = vmatprep.subr.bf16.mxu0 %v5614_v7  ;;  %4891 = vmatprep.subr.bf16.mxu1 %v5616_v10  ;;  %v2134_v7 = vunpack.c.l.s4 %v5251_v4  ;;  %v2136_v10 = vlaneseq }
 0x25d   : > { %4765 = vmatpush1.bf16.msra.mxu0 %v5620_v19  ;;  %4893 = vmatpush1.bf16.msra.mxu1 %v5622_v22 }
 0x25e   : > { %4767 = vmatprep.subr.bf16.mxu0 %v5626_v27  ;;  %4895 = vmatprep.subr.bf16.mxu1 %v5628_v28 }
 0x261   : > { %4769 = vmatpush1.bf16.msra.mxu0 %v5632_v41  ;;  %4897 = vmatpush1.bf16.msra.mxu1 %v5634_v42 }
 0x262   : > { %4771 = vmatprep.subr.bf16.mxu0 %v5638_v45  ;;  %4899 = vmatprep.subr.bf16.mxu1 %v5640_v50  ;;  %v2135_v45 = vunpack.c.0.s8 %v2134_v7  ;;  %v5871_v50 = vshrl.u32 %v2136_v10, 7 }
 0x265   : > { %4773 = vmatpush1.bf16.msra.mxu0 %v5644_v2  ;;  %4901 = vmatpush1.bf16.msra.mxu1 %v5646_v5  ;;  %v5874_v5 = vsub.s32 %v2135_v45, %v5871_v50 }
 0x266   : > { %4775 = vmatprep.subr.bf16.mxu0 %v5650_v14  ;;  %4903 = vmatprep.subr.bf16.mxu1 %v5652_v15  ;;  %v2132_v14 = vpop.permute.xlu1 %2131 }
 0x267   : > { %v2139_v15 = vrot.slane %v2132_v14, %v5874_v5 }
 0x269   : > { %4777 = vmatpush1.bf16.msra.mxu0 %v6729_v40  ;;  %4905 = vmatpush1.bf16.msra.mxu1 %v6728_v29 }
 0x26a   : > { %4779 = vmatprep.subr.bf16.mxu0 %v6731_v58  ;;  %4907 = vmatprep.subr.bf16.mxu1 %v6736_v47  ;;  %v2124_v53 = vpop.permute.xlu1 %2123 }
 0x26d   : > { %4781 = vmatpush1.bf16.msra.mxu0 %v6733_v26  ;;  %4909 = vmatpush1.bf16.msra.mxu1 %v6737_v48 }
 0x26e   : > { %4783 = vmatprep.subr.bf16.mxu0 %v5674_v17  ;;  %4911 = vmatprep.subr.bf16.mxu1 %v5676_v18  ;;  %v5878_v18 = vld [vmem:[%s5479_s19] sm:$0xff] }
 0x271   : > { %4785 = vmatpush1.bf16.msra.mxu0 %v5680_v34  ;;  %4913 = vmatpush1.bf16.msra.mxu1 %v5682_v35  ;;  %v2141_v34 = vmul.f32 %v5878_v18, %v2139_v15 }
 0x272   : > { %4787 = vmatprep.subr.bf16.mxu0 %v5686_v56  ;;  %4915 = vmatprep.subr.bf16.mxu1 %v6738_v51 }
 0x273   : > { %v2143_v44 = vcombine.high %v2141_v34, %v2141_v34 }
 0x275   : > { %4789 = vmatpush1.bf16.msra.mxu0 %v6739_v52  ;;  %4917 = vmatpush1.bf16.msra.mxu1 %v6740_v59 }
 0x276   : > { %4791 = vmatprep.subr.bf16.mxu0 %v6741_v60  ;;  %4919 = vmatprep.subr.bf16.mxu1 %v6742_v63 }
 0x279   : > { %4793 = vmatpush1.bf16.msra.mxu0 %v6743_v1  ;;  %4921 = vmatpush1.bf16.msra.mxu1 %v6744_v8 }
 0x27a   : > { %4795 = vmatprep.subr.bf16.mxu0 %v6745_v9  ;;  %4923 = vmatprep.subr.bf16.mxu1 %v6746_v12 }
 0x27d   : > { %4797 = vmatpush1.bf16.msra.mxu0 %v6747_v13  ;;  %4925 = vmatpush1.bf16.msra.mxu1 %v6748_v20 }
 0x27e   : > { %4512 = vmatprep.subr.mxu0 %v6749_v21 }
 0x280   : > { %1946 = vmatmul.mubr.f32.vlgmr.msra.gmra.mrb[4].mxu0 %v5802_v37  ;;  %2090 = vmatmul.mubr.f32.vlgmr.msra.gmra.mrb[6].mxu1 %v5802_v37 }
 0x281   : > { %2931 = vmatprep.mubr.f32.mxu1 %v6749_v21  ;;  %4514 = vmatprep.mubr.msk.f32.mxu0 %vm5252_vm6, %v6749_v21 }
 0x313   : > { %v2020_v24 = vpop.f32.mrb[4].mxu1 }
 0x314   : > { %v2022_v25 = vpop.f32.mrb[5].mxu1 }
 0x353   : > { %v1947_v32 = vpop.f32.mrb[4].mxu0  ;;  %v2091_v33 = vpop.f32.mrb[6].mxu1 }
 0x354   : > { %v1952_v36 = vmul.f32 0.00390625, %v1947_v32  ;;  %v2096_v39 = vsub.f32 %v2020_v24, %v2091_v33  ;;  %v1949_v46 = vpop.f32.mrb[5].mxu0  ;;  %v2093_v49 = vpop.f32.mrb[7].mxu1 }
 0x355   : > { %v1953_v54 = vmul.f32 0.00390625, %v1949_v46  ;;  %v2097_v55 = vsub.f32 %v2022_v25, %v2093_v49 }
 0x356   : > { %v2098_v3 = vmul.f32 0.00390625, %v2096_v39  ;;  %v2100_v22 = vmul.f32 %v1952_v36, %v1952_v36 }
 0x357   : > { %v2099_v19 = vmul.f32 0.00390625, %v2097_v55  ;;  %v2101_v28 = vmul.f32 %v1953_v54, %v1953_v54 }
 0x358   : > { %v2102_v27 = vmul.f32 %v2098_v3, %v2098_v3 }
 0x359   : > { %v2103_v41 = vmul.f32 %v2099_v19, %v2099_v19 }
 0x35a   : > { %v2104_v42 = vadd.f32 %v2102_v27, %v2100_v22 }
 0x35b   : > { %v2105_v2 = vadd.f32 %v2103_v41, %v2101_v28 }
 0x35c   : > { %5104 = vrsqrt.f32 %v2104_v42  ;;  %vm2108_vm2 = vcmp.eq.f32.partialorder %v2104_v42, inf  ;;  %v2111_v57 = vand.u32 2147483648, %v2104_v42  ;;  %vm2110_vm3 = vcmp.eq.f32.partialorder %v2104_v42, 0.0 }
 0x35d   : > { %5106 = vrsqrt.f32 %v2105_v2  ;;  %vm2115_vm4 = vcmp.eq.f32.partialorder %v2105_v2, inf  ;;  %v2118_v30 = vand.u32 2147483648, %v2105_v2  ;;  %vm2117_vm5 = vcmp.eq.f32.partialorder %v2105_v2, 0.0 }
 0x366   : > { %v5105_v17 = vpop.eup %5104 }
 0x367   : > { %v5107_v35 = vpop.eup %5106  ;;  %v2107_v56 = vmul.f32 %v5105_v17, %v2104_v42 }
 0x368   : > { %v2114_v16 = vmul.f32 %v5107_v35, %v2105_v2 }
 0x369   : > { %v2109_v0 = vsel %vm2108_vm2, %v2104_v42, %v2107_v56 }
 0x36a   : > { %v2112_v6 = vsel %vm2110_vm3, %v2111_v57, %v2109_v0  ;;  %v2116_v23 = vsel %vm2115_vm4, %v2105_v2, %v2114_v16 }
 0x36b   : > { %v2119_v31 = vsel %vm2117_vm5, %v2118_v30, %v2116_v23  ;;  %v2126_v43 = vmul.f32 %v2124_v53, %v2112_v6  ;;  %v3330_v6 = vld [vmem:[%s6636_s12 + $0x50] sm:$0xff]  ;;  %v3329_v23 = vld [vmem:[%s6636_s12 + $0x48] sm:$0xff] }
 0x36c   : > { %v2127_v62 = vmul.f32 %v2124_v53, %v2119_v31  ;;  %v3328_v53 = vld [vmem:[%s6636_s12 + $0x40] sm:$0xff]  ;;  %v3337_v31 = vld [vmem:[%s6636_s12 + $0x88] sm:$0xff] }
 0x36d   : > { %v5881_v29 = vadd.f32 %v2141_v34, %v2126_v43  ;;  %v2196_v34 = vpop.permute.xlu0 %2195  ;;  %v3339_v43 = vld [vmem:[%s6636_s12 + $0x98] sm:$0xff] }
 0x36e   : > { %v5883_v40 = vadd.f32 %v2143_v44, %v2127_v62  ;;  %v3325_v44 = vld [vmem:[%s6636_s12 + $0x28] sm:$0xff]  ;;  %v3338_v62 = vld [vmem:[%s6636_s12 + $0x90] sm:$0xff] }
 0x36f   : > { %v2148_v11 = vsel %vm591_vm0, %v5881_v29, 0.0  ;;  %v2165_v58 = vmul.f32 %v5881_v29, %v5881_v29 }
 0x370   : > { %v2149_v61 = vrot.slane %v2148_v11, 4  ;;  %v2155_v26 = vsel %vm591_vm0, %v5883_v40, 0.0  ;;  %v2166_v37 = vmul.f32 %v5883_v40, %v5883_v40 }
 0x371   : > { %v2156_v38 = vrot.slane %v2155_v26, 4  ;;  %v2167_v47 = vsel %vm591_vm0, %v2165_v58, 0.0  ;;  %v3345_v58 = vld [vmem:[%s6636_s12 + $0xc8] sm:$0xff] }
 0x372   : > { %v2150_v48 = vadd.f32 %v2149_v61, %v2148_v11  ;;  %v2168_v51 = vrot.slane %v2167_v47, 4  ;;  %v2174_v52 = vsel %vm591_vm0, %v2166_v37, 0.0  ;;  %v3343_v11 = vld [vmem:[%s6636_s12 + $0xb8] sm:$0xff]  ;;  %v3344_v61 = vld [vmem:[%s6636_s12 + $0xc0] sm:$0xff] }
 0x373   : > { %v2157_v59 = vadd.f32 %v2156_v38, %v2155_v26  ;;  %v2175_v60 = vrot.slane %v2174_v52, 4  ;;  %v2207_v26 = vld [vmem:[%s6633_s9] sm:$0xf] }
 0x374   : > { %v2151_v63 = vrot.slane %v2150_v48, 2  ;;  %v2169_v1 = vadd.f32 %v2168_v51, %v2167_v47  ;;  %v2210_v37 = vsel %vm587_vm1, %v2207_v26, 0 }
 0x375   : > { %v2158_v8 = vrot.slane %v2157_v59, 2  ;;  %v2176_v9 = vadd.f32 %v2175_v60, %v2174_v52  ;;  %v2281_v38 = vand.u32 4294901760, %v2210_v37 }
 0x376   : > { %v2152_v12 = vadd.f32 %v2151_v63, %v2150_v48  ;;  %v2170_v13 = vrot.slane %v2169_v1, 2 }
 0x377   : > { %v2159_v20 = vadd.f32 %v2158_v8, %v2157_v59  ;;  %v2177_v24 = vrot.slane %v2176_v9, 2  ;;  %v2282_v47 = vsub.f32 %v2210_v37, %v2281_v38 }
 0x378   : > { %v2153_v25 = vrot.slane %v2152_v12, 1  ;;  %v2171_v32 = vadd.f32 %v2170_v13, %v2169_v1 }
 0x379   : > { %v2160_v33 = vrot.slane %v2159_v20, 1  ;;  %v2178_v36 = vadd.f32 %v2177_v24, %v2176_v9  ;;  %v2283_v48 = vand.u32 4294901760, %v2282_v47 }
 0x37a   : > { %v2154_v39 = vadd.f32 %v2153_v25, %v2152_v12  ;;  %v2172_v46 = vrot.slane %v2171_v32, 1 }
 0x37b   : > { %v2161_v49 = vadd.f32 %v2160_v33, %v2159_v20  ;;  %v2179_v54 = vrot.slane %v2178_v36, 1  ;;  %v2284_v51 = vsub.f32 %v2282_v47, %v2283_v48  ;;  %v2208_v20 = vld [vmem:[%s6634_s10] sm:$0xf] }
 0x37c   : > { %v2163_v55 = vmul.f32 0.25, %v2154_v39  ;;  %v2173_v3 = vadd.f32 %v2172_v46, %v2171_v32  ;;  %v2673_v33 = vld [vmem:[%s6632_s8] sm:$0xf]  ;;  %v3334_v39 = vld [vmem:[%s6636_s12 + $0x70] sm:$0xff]  ;;  %v3321_v46 = vld [vmem:[%s6636_s12 + $0x8] sm:$0xff] }
 0x37d   : > { %v2164_v4 = vmul.f32 0.25, %v2161_v49  ;;  %v2180_v7 = vadd.f32 %v2179_v54, %v2178_v36  ;;  %v2285_v63 = vand.u32 4294901760, %v2284_v51  ;;  %v3333_v36 = vld [vmem:[%s6636_s12 + $0x68] sm:$0xff]  ;;  %v3322_v49 = vld [vmem:[%s6636_s12 + $0x10] sm:$0xff]  ;;  %v3332_v54 = vld [vmem:[%s6636_s12 + $0x60] sm:$0xff] }
 0x37e   : > { %v2181_v19 = vmul.f32 0.25, %v2173_v3  ;;  %v2183_v22 = vmul.f32 %v2163_v55, %v2163_v55  ;;  %v3320_v55 = vld [vmem:[%s6636_s12] sm:$0xff] }
 0x37f   : > { %v2182_v27 = vmul.f32 0.25, %v2180_v7  ;;  %v2184_v28 = vmul.f32 %v2164_v4, %v2164_v4  ;;  %v3324_v3 = vld [vmem:[%s6636_s12 + $0x20] sm:$0xff]  ;;  %v3323_v4 = vld [vmem:[%s6636_s12 + $0x18] sm:$0xff] }
 0x380   : > { %v2185_v41 = vsub.f32 %v2181_v19, %v2183_v22  ;;  %v3327_v7 = vld [vmem:[%s6636_s12 + $0x38] sm:$0xff]  ;;  %v3326_v19 = vld [vmem:[%s6636_s12 + $0x30] sm:$0xff] }
 0x381   : > { %v2186_v42 = vsub.f32 %v2182_v27, %v2184_v28  ;;  %v3331_v22 = vld [vmem:[%s6636_s12 + $0x58] sm:$0xff]  ;;  %v3336_v27 = vld [vmem:[%s6636_s12 + $0x80] sm:$0xff] }
 0x382   : > { %v2187_v45 = vadd.f32 1e-05, %v2185_v41  ;;  %v3335_v28 = vld [vmem:[%s6636_s12 + $0x78] sm:$0xff]  ;;  %v3340_v41 = vld [vmem:[%s6636_s12 + $0xa0] sm:$0xff] }
 0x383   : > { %v2188_v2 = vadd.f32 1e-05, %v2186_v42  ;;  %v3342_v42 = vld [vmem:[%s6636_s12 + $0xb0] sm:$0xff] }
 0x384   : > { %5108 = vrsqrt.f32 %v2187_v45  ;;  %v3341_v45 = vld [vmem:[%s6636_s12 + $0xa8] sm:$0xff] }
 0x385   : > { %5110 = vrsqrt.f32 %v2188_v2  ;;  %v3346_v2 = vld [vmem:[%s6636_s12 + $0xd0] sm:$0xff] }
 0x38e   : > { %v5109_v14 = vpop.eup %5108 }
 0x38f   : > { %v5111_v15 = vpop.eup %5110  ;;  %v2191_v17 = vmul.f32 %v5109_v14, %v5881_v29 }
 0x390   : > { %v2192_v35 = vmul.f32 %v5111_v15, %v5883_v40 }
 0x391   : > { %v2198_v56 = vmul.f32 %v2196_v34, %v2191_v17 }
 0x392   : > { %v2199_v57 = vmul.f32 %v2196_v34, %v2192_v35 }
 0x393   : > { %v2200_v16 = vsel %vm591_vm0, %v2198_v56, 0.0 }
 0x394   : > { %v2201_v0 = vsel %vm591_vm0, %v2199_v57, 0.0 }
 0x395   : > { %v2202_v30 = vadd.f32 %v2201_v0, %v2200_v16 }
 0x397   : > { %2203 = vadd.xlane.f32.xlu1 %v2202_v30 }
 0x3a8   : > { %3479 = vperm.xlu1 %5102, %v3325_v44  }
 0x3ac   : > { %3539 = vperm.xlu1 %5102, %v3328_v53  }
 0x3b0   : > { %3594 = vperm.xlu1 %5102, %v3330_v6  }
 0x3b4   : > { %3589 = vperm.xlu1 %5102, %v3329_v23  }
 0x3b8   : > { %3659 = vperm.xlu1 %5102, %v3337_v31  }
 0x3bc   : > { %3714 = vperm.xlu1 %5102, %v3339_v43  }
 0x3c0   : > { %3709 = vperm.xlu1 %5102, %v3338_v62  }
 0x3c4   : > { %3779 = vperm.xlu1 %5102, %v3343_v11  }
 0x3c8   : > { %3834 = vperm.xlu1 %5102, %v3345_v58  }
 0x3cc   : > { %3829 = vperm.xlu1 %5102, %v3344_v61  }
 0x424   : > { %v2204_v52 = vpop.xlane.xlu1 %2203 }
 0x425   : > { %v2206_v59 = vmul.f32 0.00390625, %v2204_v52 }
 0x427   : > { %v2213_v60 = vsel %vm591_vm0, %v2206_v59, 0 }
 0x428   : > { %v2216_v1 = vand.u32 4294901760, %v2213_v60 }
 0x42a   : > { %v2293_v8 = vsub.f32 %v2213_v60, %v2216_v1  ;;  %4513 = vmatpush3.msra.mxu0 %v2216_v1 }
 0x42b   : > { %4515 = vmatmul.mubr.f32.vlgmr.msra.gmra.mrb[6].mxu0 %v2285_v63  ;;  %4517 = vmatprep.subr.mxu0 %v6749_v21 }
 0x42c   : > { %v2294_v9 = vand.u32 4294901760, %v2293_v8  ;;  %4519 = vmatprep.mubr.msk.f32.mxu0 %vm5252_vm6, %v6749_v21 }
 0x42e   : > { %v2295_v12 = vsub.f32 %v2293_v8, %v2294_v9 }
 0x430   : > { %v2296_v13 = vand.u32 4294901760, %v2295_v12 }
 0x432   : > { %4518 = vmatpush3.msra.mxu0 %v2296_v13 }
 0x433   : > { %4520 = vmatmul.mubr.f32.vlgmr.msra.gmra.mrb[6].mxu0 %v2281_v38  ;;  %4522 = vmatprep.subr.mxu0 %v6749_v21 }
 0x434   : > { %4523 = vmatpush3.msra.mxu0 %v2293_v8  ;;  %4524 = vmatprep.mubr.msk.f32.mxu0 %vm5252_vm6, %v6749_v21 }
 0x435   : > { %4527 = vmatprep.subr.mxu0 %v6749_v21 }
 0x43b   : > { %4525 = vmatmul.mubr.f32.vlgmr.msra.gmra.mrb[6].mxu0 %v2282_v47 }
 0x43c   : > { %4528 = vmatpush3.msra.mxu0 %v2216_v1  ;;  %4529 = vmatprep.mubr.msk.f32.mxu0 %vm5252_vm6, %v6749_v21 }
 0x43d   : > { %4532 = vmatprep.subr.mxu0 %v6749_v21 }
 0x443   : > { %4530 = vmatmul.mubr.f32.vlgmr.msra.gmra.mrb[6].mxu0 %v2283_v48 }
 0x444   : > { %4533 = vmatpush3.msra.mxu0 %v2294_v9  ;;  %4534 = vmatprep.mubr.msk.f32.mxu0 %vm5252_vm6, %v6749_v21 }
 0x445   : > { %4537 = vmatprep.subr.mxu0 %v6749_v21 }
 0x44b   : > { %4535 = vmatmul.mubr.f32.vlgmr.msra.gmra.mrb[6].mxu0 %v2281_v38 }
 0x44c   : > { %4538 = vmatpush3.msra.mxu0 %v2216_v1  ;;  %4539 = vmatprep.mubr.msk.f32.mxu0 %vm5252_vm6, %v6749_v21 }
 0x453   : > { %4540 = vmatmul.mubr.f32.vlgmr.msra.gmra.mrb[6].mxu0 %v2281_v38 }
 0x454   : > { %2823 = vmatprep.mubr.f32.mxu0 %v6749_v21 }
 0x526   : > { %v2657_v24 = vpop.f32.mrb[6].mxu0 }
 0x527   : > { %v4954_v25 = vadd.f32 %v2657_v24, %v2208_v20  ;;  %v4541_v32 = vpop.f32.mrb[7].mxu0 }
 0x529   : > { %2663 = vperm.xlu0 %5101, %v4954_v25  }
 0x52d   : > { %2728 = vperm.xlu0 %5101, %v2673_v33  }
 0x531   : > { %3358 = vperm.xlu0 %5101, %v3333_v36  }
 0x535   : > { %3363 = vperm.xlu0 %5101, %v3334_v39  }
 0x539   : > { %3414 = vperm.xlu0 %5101, %v3321_v46  }
 0x53d   : > { %3419 = vperm.xlu0 %5101, %v3322_v49   ;;  %v2739_v49 = vld [vmem:[%s6635_s11] sm:$0xff] }
 0x541   : > { %3353 = vperm.xlu0 %5101, %v3332_v54   ;;  %v2745_v54 = vsel %vm587_vm1, %v2739_v49, 0 }
 0x545   : > { %3409 = vperm.xlu0 %5101, %v3320_v55   ;;  %v2740_v55 = vld [vmem:[%s6635_s11 + $0x8] sm:$0xff] }
 0x549   : > { %3474 = vperm.xlu0 %5101, %v3324_v3  }
 0x54d   : > { %3469 = vperm.xlu0 %5101, %v3323_v4  }
 0x551   : > { %3534 = vperm.xlu0 %5101, %v3327_v7  }
 0x555   : > { %3529 = vperm.xlu0 %5101, %v3326_v19   ;;  %v6030_v19 = vand.u32 4294901760, %v2745_v54 }
 0x559   : > { %3599 = vperm.xlu0 %5101, %v3331_v22  }
 0x55d   : > { %3654 = vperm.xlu0 %5101, %v3336_v27   ;;  %v2748_v27 = vsel %vm587_vm1, %v2740_v55, 0 }
 0x561   : > { %3649 = vperm.xlu0 %5101, %v3335_v28   ;;  %v2825_v28 = vsub.f32 %v2745_v54, %v6030_v19 }
 0x565   : > { %3719 = vperm.xlu0 %5101, %v3340_v41  }
 0x569   : > { %3774 = vperm.xlu0 %5101, %v3342_v42  }
 0x56d   : > { %3769 = vperm.xlu0 %5101, %v3341_v45   ;;  %v2741_v45 = vld [vmem:[%s6635_s11 + $0x10] sm:$0xff] }
 0x571   : > { %3839 = vperm.xlu0 %5101, %v3346_v2   ;;  %v6039_v2 = vand.u32 4294901760, %v2748_v27 }
 0x5a8   : > { %v2664_v14 = vpop.permute.xlu0 %2663 }
 0x5a9   : > { %v2666_v15 = vmul.f32 %v2664_v14, %v5881_v29  ;;  %v2667_v17 = vmul.f32 %v2664_v14, %v5883_v40  ;;  %v2826_v14 = vand.u32 4294901760, %v2825_v28 }
 0x5ab   : > { %v2670_v34 = vcombine.low %v2666_v15, %v2667_v17  ;;  %v2751_v17 = vsel %vm587_vm1, %v2741_v45, 0 }
 0x5ac   : > { %v2729_v7 = vpop.permute.xlu0 %2728 }
 0x5ad   : > { %v6012_v35 = vadd.f32 %v5878_v18, %v2670_v34  ;;  %v2736_v42 = vrot.slane %v2729_v7, %v5874_v5  ;;  %v2836_v34 = vsub.f32 %v2748_v27, %v6039_v2 }
 0x5af   : > { %6750 = vst [vmem:[#allocation20_spill] sm:$0xff] %v6012_v35  ;;  %v2675_v56 = vcombine.high %v6012_v35, %v6012_v35  ;;  %v2677_v57 = vsel %vm591_vm0, %v6012_v35, 0.0  ;;  %v2693_v16 = vmul.f32 %v6012_v35, %v6012_v35 }
 0x5b0   : > { %v2678_v0 = vrot.slane %v2677_v57, 4 }
 0x5b1   : > { %v2684_v30 = vsel %vm591_vm0, %v2675_v56, 0.0  ;;  %v2695_v44 = vcombine.high %v2693_v16, %v2693_v16  ;;  %v2697_v29 = vsel %vm591_vm0, %v2693_v16, 0.0  ;;  %v2827_v56 = vsub.f32 %v2825_v28, %v2826_v14 }
 0x5b2   : > { %v2679_v40 = vadd.f32 %v2678_v0, %v2677_v57  ;;  %v2685_v53 = vrot.slane %v2684_v30, 4  ;;  %v2698_v6 = vrot.slane %v2697_v29, 4 }
 0x5b3   : > { %v2704_v18 = vsel %vm591_vm0, %v2695_v44, 0.0  ;;  %v2846_v44 = vand.u32 4294901760, %v2751_v17 }
 0x5b4   : > { %v2680_v23 = vrot.slane %v2679_v40, 2  ;;  %v2686_v31 = vadd.f32 %v2685_v53, %v2684_v30  ;;  %v2699_v43 = vadd.f32 %v2698_v6, %v2697_v29  ;;  %v2705_v62 = vrot.slane %v2704_v18, 4 }
 0x5b5   : > { %v2837_v30 = vand.u32 4294901760, %v2836_v34  ;;  %v2828_v53 = vand.u32 4294901760, %v2827_v56 }
 0x5b6   : > { %v2681_v11 = vadd.f32 %v2680_v23, %v2679_v40  ;;  %v2687_v58 = vrot.slane %v2686_v31, 2  ;;  %v2700_v61 = vrot.slane %v2699_v43, 2  ;;  %v2706_v26 = vadd.f32 %v2705_v62, %v2704_v18 }
 0x5b7   : > { %v2838_v6 = vsub.f32 %v2836_v34, %v2837_v30 }
 0x5b8   : > { %v2682_v37 = vrot.slane %v2681_v11, 1  ;;  %v2688_v38 = vadd.f32 %v2687_v58, %v2686_v31  ;;  %v2701_v47 = vadd.f32 %v2700_v61, %v2699_v43  ;;  %v2707_v48 = vrot.slane %v2706_v26, 2 }
 0x5b9   : > { %v2847_v31 = vsub.f32 %v2751_v17, %v2846_v44 }
 0x5ba   : > { %v2683_v51 = vadd.f32 %v2682_v37, %v2681_v11  ;;  %v2689_v52 = vrot.slane %v2688_v38, 1  ;;  %v2702_v59 = vrot.slane %v2701_v47, 1  ;;  %v2708_v60 = vadd.f32 %v2707_v48, %v2706_v26 }
 0x5bb   : > { %v2848_v62 = vand.u32 4294901760, %v2847_v31  ;;  %v2839_v11 = vand.u32 4294901760, %v2838_v6 }
 0x5bc   : > { %v2690_v63 = vadd.f32 %v2689_v52, %v2688_v38  ;;  %v2691_v1 = vmul.f32 0.25, %v2683_v51  ;;  %v2703_v8 = vadd.f32 %v2702_v59, %v2701_v47  ;;  %v2709_v9 = vrot.slane %v2708_v60, 1 }
 0x5bd   : > { %v2849_v26 = vsub.f32 %v2847_v31, %v2848_v62 }
 0x5be   : > { %v2692_v12 = vmul.f32 0.25, %v2690_v63  ;;  %v2710_v13 = vadd.f32 %v2709_v9, %v2708_v60  ;;  %v2711_v20 = vmul.f32 0.25, %v2703_v8  ;;  %v2713_v24 = vmul.f32 %v2691_v1, %v2691_v1 }
 0x5bf   : > { %v2850_v47 = vand.u32 4294901760, %v2849_v26 }
 0x5c0   : > { %v2712_v25 = vmul.f32 0.25, %v2710_v13  ;;  %v2714_v32 = vmul.f32 %v2692_v12, %v2692_v12  ;;  %v2715_v33 = vsub.f32 %v2711_v20, %v2713_v24 }
 0x5c2   : > { %v2716_v36 = vsub.f32 %v2712_v25, %v2714_v32  ;;  %v2717_v39 = vadd.f32 1e-05, %v2715_v33 }
 0x5c4   : > { %v2718_v46 = vadd.f32 1e-05, %v2716_v36  ;;  %5112 = vrsqrt.f32 %v2717_v39 }
 0x5c6   : > { %5114 = vrsqrt.f32 %v2718_v46  ;;  %v6096_v46 = vpop.permute.xlu0 %3358 }
 0x5ca   : > { %v6102_v49 = vpop.permute.xlu0 %3363 }
 0x5ce   : > { %v5113_v3 = vpop.eup %5112  ;;  %v6112_v54 = vpop.permute.xlu0 %3414 }
 0x5d0   : > { %v5115_v4 = vpop.eup %5114 }
 0x5d1   : > { %v2723_v22 = vcombine.low %v5113_v3, %v5115_v4 }
 0x5d2   : > { %v6118_v55 = vpop.permute.xlu0 %3419 }
 0x5d3   : > { %v2725_v41 = vmul.f32 %v2723_v22, %v6012_v35 }
 0x5d5   : > { %v2738_v15 = vmul.f32 %v2736_v42, %v2725_v41 }
 0x5d6   : > { %v6128_v3 = vpop.permute.xlu0 %3353 }
 0x5d7   : > { %v2743_v57 = vcombine.high %v2738_v15, %v2738_v15  ;;  %v2753_v16 = vsel %vm591_vm0, %v2738_v15, 0 }
 0x5d8   : > { %v2759_v0 = vand.u32 4294901760, %v2753_v16 }
 0x5d9   : > { %v2755_v5 = vsel %vm591_vm0, %v2743_v57, 0 }
 0x5da   : > { %v2757_v29 = vand.u32 4294901760, %v2755_v5  ;;  %v2864_v40 = vsub.f32 %v2753_v16, %v2759_v0  ;;  %v6134_v4 = vpop.permute.xlu0 %3409 }
 0x5dc   : > { %v2858_v18 = vsub.f32 %v2755_v5, %v2757_v29  ;;  %2758 = vmatprep.subr.mxu0 %v2757_v29  ;;  %v2865_v23 = vand.u32 4294901760, %v2864_v40 }
 0x5dd   : > { %2760 = vmatpush1.msra.mxu0 %v2759_v0 }
 0x5de   : > { %v2859_v43 = vand.u32 4294901760, %v2858_v18  ;;  %2829 = vmatmul.mubr.f32.vlgmr.msra.gmra.mrb[8].mxu0 %v2828_v53  ;;  %v2866_v58 = vsub.f32 %v2864_v40, %v2865_v23  ;;  %v6144_v7 = vpop.permute.xlu0 %3474 }
 0x5df   : > { %2834 = vmatprep.mubr.f32.mxu0 %v6749_v21 }
 0x5e0   : > { %v2860_v61 = vsub.f32 %v2858_v18, %v2859_v43  ;;  %v2867_v38 = vand.u32 4294901760, %v2866_v58 }
 0x5e2   : > { %v2861_v37 = vand.u32 4294901760, %v2860_v61  ;;  %2840 = vmatmul.mubr.f32.gmra.mrb[10].mxu0 %v2839_v11  ;;  %v6152_v22 = vpop.permute.xlu0 %3469  ;;  %v3455_v61 = vsub.s32 1, %v5871_v50 }
 0x5e3   : > { %2845 = vmatprep.mubr.f32.mxu0 %v6749_v21 }
 0x5e4   : > { %2862 = vmatprep.subr.mxu1 %v2861_v37 }
 0x5e5   : > { %2868 = vmatpush1.msra.mxu1 %v2867_v38 }
 0x5e6   : > { %2933 = vmatmul.mubr.f32.vlgmr.msra.gmra.mrb[8].mxu1 %v6030_v19  ;;  %2955 = vmatprep.subr.mxu1 %v2858_v18 }
 0x5e7   : > { %2958 = vmatpush1.msra.mxu1 %v2864_v40  ;;  %2938 = vmatprep.mubr.f32.mxu1 %v6749_v21 }
 0x5e8   : > { %3047 = vmatprep.subr.mxu1 %v2757_v29  ;;  %2851 = vmatmul.mubr.f32.gmra.mrb[12].mxu0 %v2850_v47 }
 0x5e9   : > { %3955 = vmatprep.mubr.f32.mxu0 %v6749_v21 }
 0x5ea   : > { %2940 = vmatmul.mubr.f32.gmra.mrb[10].mxu1 %v6039_v2 }
 0x5eb   : > { %2945 = vmatprep.mubr.f32.mxu1 %v6749_v21 }
 0x5ee   : > { %2947 = vmatmul.mubr.f32.gmra.mrb[12].mxu1 %v2846_v44 }
 0x5ef   : > { %3021 = vmatprep.mubr.f32.mxu1 %v6749_v21 }
 0x5f2   : > { %3024 = vmatmul.mubr.f32.vlgmr.msra.gmra.mrb[8].mxu1 %v2825_v28  ;;  %v6164_v28 = vpop.permute.xlu0 %3534 }
 0x5f3   : > { %3049 = vmatpush1.msra.mxu1 %v2759_v0  ;;  %3029 = vmatprep.mubr.f32.mxu1 %v6749_v21 }
 0x5f4   : > { %3143 = vmatprep.subr.mxu1 %v2859_v43  ;;  %v6237_v43 = vld [vmem:[%s6640_s16] sm:$0xff] }
 0x5f6   : > { %3032 = vmatmul.mubr.f32.gmra.mrb[10].mxu1 %v2836_v34  ;;  %v6172_v42 = vpop.permute.xlu0 %3529 }
 0x5f7   : > { %3037 = vmatprep.mubr.f32.mxu1 %v6749_v21 }
 0x5fa   : > { %3040 = vmatmul.mubr.f32.gmra.mrb[12].mxu1 %v2847_v31  ;;  %v3395_v31 = vsub.s32 0, %v5871_v50 }
 0x5fb   : > { %3112 = vmatprep.mubr.f32.mxu1 %v6749_v21 }
 0x5fc   : > { %v6252_v26 = vrot.slane %v6237_v43, %v3395_v31 }
 0x5fe   : > { %3116 = vmatmul.mubr.f32.vlgmr.msra.gmra.mrb[8].mxu1 %v2826_v14 }
 0x5ff   : > { %3147 = vmatpush1.msra.mxu1 %v2865_v23  ;;  %3121 = vmatprep.mubr.f32.mxu1 %v6749_v21  ;;  %v6231_v23 = vand.u32 127, %v2136_v10  ;;  %v3515_v10 = vsub.s32 2, %v5871_v50 }
 0x600   : > { %3233 = vmatprep.subr.mxu1 %v2757_v29 }
 0x601   : > { %vm3386_vm7 = vcmp.lt.s32.totalorder %v6231_v23, 17  ;;  %vm3446_vm8 = vcmp.lt.s32.totalorder %v6231_v23, 16  ;;  %vm3506_vm9 = vcmp.lt.s32.totalorder %v6231_v23, 15  ;;  %vm3566_vm10 = vcmp.lt.s32.totalorder %v6231_v23, 1 }
 0x602   : > { %3125 = vmatmul.mubr.f32.gmra.mrb[10].mxu1 %v2837_v30  ;;  %vm3626_vm11 = vcmp.lt.s32.totalorder %v6231_v23, 127  ;;  %vm3686_vm12 = vcmp.lt.s32.totalorder %v6231_v23, 113  ;;  %vm3746_vm13 = vcmp.lt.s32.totalorder %v6231_v23, 112  ;;  %vm3806_vm15 = vcmp.lt.s32.totalorder %v6231_v23, 111 }
 0x603   : > { %3130 = vmatprep.mubr.f32.mxu1 %v6749_v21 }
 0x606   : > { %3134 = vmatmul.mubr.f32.gmra.mrb[12].mxu1 %v2848_v62  ;;  %v6242_v62 = vld [vmem:[%s6640_s16 + $0x8] sm:$0xff] }
 0x607   : > { %3210 = vmatprep.mubr.f32.mxu1 %v6749_v21  ;;  %v6255_v37 = vrot.slane %v6242_v62, %v3395_v31 }
 0x60a   : > { %3212 = vmatmul.mubr.f32.vlgmr.msra.gmra.mrb[8].mxu1 %v6030_v19 }
 0x60b   : > { %3235 = vmatpush1.msra.mxu1 %v2759_v0  ;;  %3217 = vmatprep.mubr.f32.mxu1 %v6749_v21 }
 0x60e   : > { %3219 = vmatmul.mubr.f32.gmra.mrb[10].mxu1 %v6039_v2 }
 0x60f   : > { %3224 = vmatprep.mubr.f32.mxu1 %v6749_v21 }
 0x612   : > { %3226 = vmatmul.mubr.f32.gmra.mrb[12].mxu1 %v2846_v44 }
 0x613   : > { %3298 = vmatprep.mubr.f32.mxu1 %v6749_v21 }
 0x616   : > { %3300 = vmatmul.mubr.f32.vlgmr.msra.gmra.mrb[8].mxu1 %v6030_v19  ;;  %v6150_v19 = vpop.permute.xlu1 %3479 }
 0x617   : > { %3305 = vmatprep.mubr.f32.mxu1 %v6749_v21 }
 0x61a   : > { %3307 = vmatmul.mubr.f32.gmra.mrb[10].mxu1 %v6039_v2  ;;  %v6162_v27 = vpop.permute.xlu1 %3539  ;;  %v6184_v2 = vpop.permute.xlu0 %3599 }
 0x61b   : > { %3312 = vmatprep.mubr.f32.mxu1 %v6749_v21 }
 0x61e   : > { %3314 = vmatmul.mubr.f32.gmra.mrb[12].mxu1 %v2846_v44  ;;  %v6170_v41 = vpop.permute.xlu1 %3594  ;;  %v6192_v15 = vpop.permute.xlu0 %3654 }
 0x622   : > { %v6182_v45 = vpop.permute.xlu1 %3589  ;;  %v6204_v34 = vpop.permute.xlu0 %3649 }
 0x626   : > { %v6190_v14 = vpop.permute.xlu1 %3659  ;;  %v6212_v57 = vpop.permute.xlu0 %3719 }
 0x627   : > { %6751 = vst [vmem:[#allocation19_spill] sm:$0xff] %v6212_v57 }
 0x62a   : > { %v6202_v17 = vpop.permute.xlu1 %3714  ;;  %v6220_v0 = vpop.permute.xlu0 %3774 }
 0x62e   : > { %v6210_v56 = vpop.permute.xlu1 %3709  ;;  %v6224_v5 = vpop.permute.xlu0 %3769 }
 0x632   : > { %v6218_v16 = vpop.permute.xlu1 %3779  ;;  %v6228_v29 = vpop.permute.xlu0 %3839 }
 0x633   : > { %6752 = vst [vmem:[#allocation21_spill] sm:$0xff] %v6218_v16  ;;  %6755 = vst [vmem:[#allocation24_spill] sm:$0xff] %v6228_v29 }
 0x636   : > { %v6222_v30 = vpop.permute.xlu1 %3834 }
 0x637   : > { %6753 = vst [vmem:[#allocation23_spill] sm:$0xff] %v6222_v30 }
 0x63a   : > { %v6226_v44 = vpop.permute.xlu1 %3829 }
 0x63b   : > { %6754 = vst [vmem:[#allocation22_spill] sm:$0xff] %v6226_v44 }
 0x6b1   : > { %v2830_v48 = vpop.f32.mrb[8].mxu0 }
 0x6b2   : > { %v2832_v51 = vpop.f32.mrb[9].mxu0 }
 0x6b5   : > { %v2841_v52 = vpop.f32.mrb[10].mxu0 }
 0x6b6   : > { %v2843_v59 = vpop.f32.mrb[11].mxu0 }
 0x6bb   : > { %v2852_v60 = vpop.f32.mrb[12].mxu0 }
 0x6bc   : > { %v2854_v63 = vpop.f32.mrb[13].mxu0 }
 0x6e9   : > { %v3301_v1 = vpop.f32.mrb[8].mxu1 }
 0x6ea   : > { %v6068_v8 = vadd.f32 %v3301_v1, %v2830_v48  ;;  %v3303_v9 = vpop.f32.mrb[9].mxu1  ;;  %v3575_v48 = vsub.s32 3, %v5871_v50 }
 0x6eb   : > { %v6070_v12 = vadd.f32 %v3303_v9, %v2832_v51  ;;  %v3635_v51 = vsub.s32 5, %v5871_v50  ;;  %v6278_v9 = vrot.slane %v6237_v43, %v3515_v10 }
 0x6ec   : > { %3434 = vrot.lane.b32.xlu1 %v6068_v8, %s5253_s23  ;;  %3372 = vrot.lane.b32.xlu0 %v6068_v8, %s5254_s17  ;;  %v3366_v38 = vmul.f32 %v6068_v8, %v6128_v3 }
 0x6ed   : > { %v3308_v13 = vpop.f32.mrb[10].mxu1  ;;  %v3367_v47 = vmul.f32 %v6070_v12, %v6128_v3  ;;  %v6291_v3 = vrot.slane %v6242_v62, %v3575_v48 }
 0x6ee   : > { %v6076_v20 = vadd.f32 %v3308_v13, %v2841_v52  ;;  %v3310_v24 = vpop.f32.mrb[11].mxu1 }
 0x6ef   : > { %v6078_v25 = vadd.f32 %v3310_v24, %v2843_v59 }
 0x6f0   : > { %3554 = vrot.lane.b32.xlu1 %v6068_v8, %s5255_s25  ;;  %3494 = vrot.lane.b32.xlu0 %v6068_v8, %s5256_s1 }
 0x6f1   : > { %v3315_v32 = vpop.f32.mrb[12].mxu1 }
 0x6f2   : > { %v6084_v33 = vadd.f32 %v3315_v32, %v2852_v60  ;;  %v3317_v36 = vpop.f32.mrb[13].mxu1  ;;  %v6267_v60 = vrot.slane %v6237_v43, %v3455_v61  ;;  %v3695_v32 = vsub.s32 6, %v5871_v50 }
 0x6f3   : > { %v6086_v39 = vadd.f32 %v3317_v36, %v2854_v63  ;;  %v6270_v63 = vrot.slane %v6242_v62, %v3455_v61  ;;  %v6288_v36 = vrot.slane %v6237_v43, %v3575_v48 }
 0x6f4   : > { %3674 = vrot.lane.b32.xlu1 %v6068_v8, %s5257_s21  ;;  %3614 = vrot.lane.b32.xlu0 %v6068_v8, %s5258_s29 }
 0x6f8   : > { %3734 = vrot.lane.b32.xlu0 %v6068_v8, %s5259_s18  ;;  %3378 = vrot.lane.b32.xlu1 %v6070_v12, %s5254_s17 }
 0x6fc   : > { %3440 = vrot.lane.b32.xlu0 %v6070_v12, %s5253_s23  ;;  %3500 = vrot.lane.b32.xlu1 %v6070_v12, %s5256_s1 }
 0x700   : > { %3560 = vrot.lane.b32.xlu0 %v6070_v12, %s5255_s25  ;;  %3620 = vrot.lane.b32.xlu1 %v6070_v12, %s5258_s29 }
 0x704   : > { %3680 = vrot.lane.b32.xlu0 %v6070_v12, %s5257_s21  ;;  %3740 = vrot.lane.b32.xlu1 %v6070_v12, %s5259_s18 }
 0x708   : > { %3436 = vrot.lane.b32.xlu1 %v6076_v20, %s5253_s23  ;;  %3374 = vrot.lane.b32.xlu0 %v6076_v20, %s5254_s17 }
 0x70c   : > { %3556 = vrot.lane.b32.xlu1 %v6076_v20, %s5255_s25  ;;  %3496 = vrot.lane.b32.xlu0 %v6076_v20, %s5256_s1 }
 0x710   : > { %3676 = vrot.lane.b32.xlu1 %v6076_v20, %s5257_s21  ;;  %3616 = vrot.lane.b32.xlu0 %v6076_v20, %s5258_s29 }
 0x714   : > { %3736 = vrot.lane.b32.xlu0 %v6076_v20, %s5259_s18  ;;  %3442 = vrot.lane.b32.xlu1 %v6078_v25, %s5253_s23 }
 0x718   : > { %3796 = vrot.lane.b32.xlu0 %v6076_v20, %s5260_s26  ;;  %3562 = vrot.lane.b32.xlu1 %v6078_v25, %s5255_s25 }
 0x71c   : > { %3682 = vrot.lane.b32.xlu1 %v6078_v25, %s5257_s21  ;;  %3380 = vrot.lane.b32.xlu0 %v6078_v25, %s5254_s17 }
 0x720   : > { %3502 = vrot.lane.b32.xlu0 %v6078_v25, %s5256_s1  ;;  %3498 = vrot.lane.b32.xlu1 %v6084_v33, %s5256_s1 }
 0x724   : > { %3622 = vrot.lane.b32.xlu0 %v6078_v25, %s5258_s29  ;;  %3618 = vrot.lane.b32.xlu1 %v6084_v33, %s5258_s29 }
 0x728   : > { %3742 = vrot.lane.b32.xlu0 %v6078_v25, %s5259_s18  ;;  %3738 = vrot.lane.b32.xlu1 %v6084_v33, %s5259_s18 }
 0x72c   : > { %3798 = vrot.lane.b32.xlu1 %v6084_v33, %s5260_s26  ;;  %3376 = vrot.lane.b32.xlu0 %v6084_v33, %s5254_s17 }
 0x730   : > { %3438 = vrot.lane.b32.xlu0 %v6084_v33, %s5253_s23  ;;  %3382 = vrot.lane.b32.xlu1 %v6086_v39, %s5254_s17 }
 0x734   : > { %3558 = vrot.lane.b32.xlu0 %v6084_v33, %s5255_s25  ;;  %3504 = vrot.lane.b32.xlu1 %v6086_v39, %s5256_s1  ;;  %s6764_s1 = sld [smem:[#allocation12_spill]] }
 0x738   : > { %3678 = vrot.lane.b32.xlu0 %v6084_v33, %s5257_s21  ;;  %3624 = vrot.lane.b32.xlu1 %v6086_v39, %s5258_s29 }
 0x73a   : > { %s569_s29 = sand.u32 1, %s6764_s1  }
 0x73b   : > { %s4385_s30 = scalar_lea.sflag [#allocation4], %s569_s29 }
 0x73c   : > { %3444 = vrot.lane.b32.xlu0 %v6086_v39, %s5253_s23  ;;  %3744 = vrot.lane.b32.xlu1 %v6086_v39, %s5259_s18  ;;  %s4488_s18 = sshll.u32 %s569_s29, 3 }
 0x73d   : > { %s571_s24 = scalar_lea.vmem [#allocation7], %s4488_s18 }
 0x73e   : > { %s4399_s19 = sshll.u32 %s571_s24, 4  ;;  %s6584_s19 = int_to_ptr.vmem [resolvable:$true] %s4399_s19 }
 0x73f   : > { %s5173_s23 = scalar_lea.vmem %s6584_s19, 128 }
 0x740   : > { %3564 = vrot.lane.b32.xlu0 %v6086_v39, %s5255_s25  ;;  %3804 = vrot.lane.b32.xlu1 %v6086_v39, %s5260_s26  ;;  %p5174_p12 = scmp.ne.s32.totalorder %s6584_s19, %s5173_s23 }
 0x744   : > { %3684 = vrot.lane.b32.xlu0 %v6086_v39, %s5257_s21  ;;  %3800 = vrot.lane.b32.xlu1 %v6070_v12, %s5260_s26  ;;  %v6281_v12 = vrot.slane %v6242_v62, %v3515_v10  ;;  %s6765_s21 = sld [smem:[#allocation17_spill]] }
 0x748   : > { %3802 = vrot.lane.b32.xlu0 %v6078_v25, %s5260_s26 }
 0x74a   : > { %p6768_p1 = scmp.ne.s32.totalorder %s6765_s21, 0 }
 0x74c   : > { %3794 = vrot.lane.b32.xlu0 %v6068_v8, %s5260_s26  ;;  %s4499_s26 = sshll.u32 %s5373_s28, 7  ;;  %p5175_p2 = pnand %p5174_p12, %p6768_p1 }
 0x74d   : > { %s6582_s22 = scalar_lea.hbm %s6767_s20, %s4499_s26  ;;  %s5261_s28 = smov [#allocation7]  }
 0x74e   : > { %p5176_p3 = pneg %p5175_p2  ;;  %s5177_s17 = sshll.u32 %s5261_s28, 4  ;;  %s5178_s17 = int_to_ptr.vmem [resolvable:$false] %s5177_s17 }
 0x74f   : > { %s5179_s25 = scalar_lea.vmem %s5178_s17, 256  ;;  %p5180_p4 = scmp.lt.s32.totalorder %s6584_s19, %s5178_s17 }
 0x750   : > { %p5181_p7 = scmp.lt.s32.totalorder %s5179_s25, %s5173_s23 }
 0x752   : > { %p5182_p8 = por %p5181_p7, %p5180_p4 }
 0x754   : > { %p5183_p11 = pnand %p5182_p8, %p5176_p3 }
 0x75e   : > { %v3373_v40 = vpop.permute.xlu0 %3372  ;;  %v3435_v53 = vpop.permute.xlu1 %3434 }
 0x762   : > { %v3495_v6 = vpop.permute.xlu0 %3494  ;;  %v3555_v18 = vpop.permute.xlu1 %3554 }
 0x766   : > { %v6244_v11 = vpop.permute.xlu0 %3614  ;;  %v6246_v58 = vpop.permute.xlu1 %3674 }
 0x76a   : > { %v6263_v52 = vpop.permute.xlu0 %3734  ;;  %v3379_v59 = vpop.permute.xlu1 %3378 }
 0x76b   : > { %v3387_v1 = vsel %vm3386_vm7, %v3373_v40, %v3379_v59  ;;  %v3390_v8 = vsel %vm3386_vm7, %v3379_v59, %v3373_v40  ;;  %v6295_v40 = vrot.slane %v6237_v43, %v3635_v51 }
 0x76c   : > { %v3401_v13 = vmul.f32 %v6252_v26, %v3390_v8  ;;  %v3402_v24 = vmul.f32 %v6255_v37, %v3387_v1  ;;  %v6300_v1 = vrot.slane %v6242_v62, %v3635_v51  ;;  %v3755_v8 = vsub.s32 7, %v5871_v50 }
 0x76d   : > { %v6315_v50 = vrot.slane %v6237_v43, %v3695_v32 }
 0x76e   : > { %v3422_v31 = vmul.f32 %v6134_v4, %v3401_v13  ;;  %v3423_v61 = vmul.f32 %v6134_v4, %v3402_v24  ;;  %v3441_v10 = vpop.permute.xlu0 %3440  ;;  %v3501_v59 = vpop.permute.xlu1 %3500 }
 0x76f   : > { %v3447_v48 = vsel %vm3446_vm8, %v3435_v53, %v3441_v10  ;;  %v3450_v35 = vsel %vm3446_vm8, %v3441_v10, %v3435_v53  ;;  %v3507_v21 = vsel %vm3506_vm9, %v3495_v6, %v3501_v59  ;;  %v3510_v13 = vsel %vm3506_vm9, %v3501_v59, %v3495_v6 }
 0x770   : > { %v3461_v4 = vmul.f32 %v6267_v60, %v3450_v35  ;;  %v3462_v24 = vmul.f32 %v6270_v63, %v3447_v48  ;;  %v3521_v51 = vmul.f32 %v6278_v9, %v3510_v13  ;;  %v3522_v44 = vmul.f32 %v6281_v12, %v3507_v21 }
 0x771   : > { %v6320_v53 = vrot.slane %v6242_v62, %v3695_v32  ;;  %v3428_v10 = vadd.f32 %v3422_v31, %v3366_v38  ;;  %v3429_v6 = vadd.f32 %v3423_v61, %v3367_v47  ;;  %v6343_v31 = vrot.slane %v6242_v62, %v3755_v8 }
 0x772   : > { %v3482_v35 = vmul.f32 %v6152_v22, %v3461_v4  ;;  %v3483_v59 = vmul.f32 %v6152_v22, %v3462_v24  ;;  %v3561_v48 = vpop.permute.xlu0 %3560  ;;  %v3621_v30 = vpop.permute.xlu1 %3620  ;;  %v3542_v29 = vmul.f32 %v6172_v42, %v3521_v51  ;;  %v3543_v16 = vmul.f32 %v6172_v42, %v3522_v44 }
 0x773   : > { %v3567_v21 = vsel %vm3566_vm10, %v3555_v18, %v3561_v48  ;;  %v3570_v32 = vsel %vm3566_vm10, %v3561_v48, %v3555_v18  ;;  %v3627_v22 = vsel %vm3626_vm11, %v6244_v11, %v3621_v30  ;;  %v3630_v42 = vsel %vm3626_vm11, %v3621_v30, %v6244_v11 }
 0x774   : > { %v3488_v13 = vadd.f32 %v3482_v35, %v3428_v10  ;;  %v3489_v57 = vadd.f32 %v3483_v59, %v3429_v6  ;;  %v3581_v38 = vmul.f32 %v6288_v36, %v3570_v32  ;;  %v3582_v47 = vmul.f32 %v6291_v3, %v3567_v21 }
 0x775   : > { %v6340_v44 = vrot.slane %v6237_v43, %v3755_v8  ;;  %v3641_v6 = vmul.f32 %v6295_v40, %v3627_v22  ;;  %v3642_v35 = vmul.f32 %v6300_v1, %v3630_v42 }
 0x776   : > { %v3548_v18 = vadd.f32 %v3542_v29, %v3488_v13  ;;  %v3549_v61 = vadd.f32 %v3543_v16, %v3489_v57  ;;  %v3602_v4 = vmul.f32 %v6182_v45, %v3581_v38  ;;  %v3603_v24 = vmul.f32 %v6182_v45, %v3582_v47  ;;  %v3681_v51 = vpop.permute.xlu0 %3680  ;;  %v3741_v10 = vpop.permute.xlu1 %3740 }
 0x777   : > { %v3687_v30 = vsel %vm3686_vm12, %v6246_v58, %v3681_v51  ;;  %v3690_v43 = vsel %vm3686_vm12, %v3681_v51, %v6246_v58  ;;  %v3662_v62 = vmul.f32 %v6204_v34, %v3641_v6  ;;  %v3663_v11 = vmul.f32 %v6204_v34, %v3642_v35 }
 0x778   : > { %v3608_v29 = vadd.f32 %v3602_v4, %v3548_v18  ;;  %v3609_v57 = vadd.f32 %v3603_v24, %v3549_v61  ;;  %v3701_v16 = vmul.f32 %v6315_v50, %v3687_v30  ;;  %v3702_v45 = vmul.f32 %v6320_v53, %v3690_v43 }
 0x779   : > { %v3747_v8 = vsel %vm3746_vm13, %v6263_v52, %v3741_v10  ;;  %v3750_v59 = vsel %vm3746_vm13, %v3741_v10, %v6263_v52 }
 0x77a   : > { %v3722_v58 = vmul.f32 %v6210_v56, %v3701_v16  ;;  %v3723_v48 = vmul.f32 %v6210_v56, %v3702_v45  ;;  %v3761_v21 = vmul.f32 %v6340_v44, %v3747_v8  ;;  %v3762_v32 = vmul.f32 %v6343_v31, %v3750_v59  ;;  %v3375_v13 = vpop.permute.xlu0 %3374  ;;  %v3437_v38 = vpop.permute.xlu1 %3436 }
 0x77b   : > { %v3668_v47 = vadd.f32 %v3662_v62, %v3608_v29  ;;  %v3669_v34 = vadd.f32 %v3663_v11, %v3609_v57  ;;  %v3368_v8 = vmul.f32 %v6076_v20, %v6096_v46 }
 0x77c   : > { %v3782_v18 = vmul.f32 %v6224_v5, %v3761_v21  ;;  %v3783_v61 = vmul.f32 %v6224_v5, %v3762_v32 }
 0x77d   : > { %v3728_v22 = vadd.f32 %v3722_v58, %v3668_v47  ;;  %v3729_v42 = vadd.f32 %v3723_v48, %v3669_v34 }
 0x77e   : > { %v3497_v4 = vpop.permute.xlu0 %3496  ;;  %v3557_v52 = vpop.permute.xlu1 %3556 }
 0x77f   : > { %v6371_v24 = vadd.f32 %v3782_v18, %v3728_v22  ;;  %v6373_v51 = vadd.f32 %v3783_v61, %v3729_v42 }
 0x781   : > { %6756 = vst [vmem:[#allocation25_spill] sm:$0xff] %v6373_v51 }
 0x782   : > { %v3617_v56 = vpop.permute.xlu0 %3616  ;;  %v6375_v10 = vpop.permute.xlu1 %3676 }
 0x786   : > { %v6377_v6 = vpop.permute.xlu0 %3736  ;;  %v3443_v35 = vpop.permute.xlu1 %3442 }
 0x787   : > { %v3451_v29 = vsel %vm3446_vm8, %v3443_v35, %v3437_v38 }
 0x788   : > { %v3463_v45 = vmul.f32 %v6267_v60, %v3451_v29 }
 0x78a   : > { %v6379_v30 = vpop.permute.xlu0 %3796  ;;  %v3563_v43 = vpop.permute.xlu1 %3562  ;;  %v3484_v47 = vmul.f32 %v6144_v7, %v3463_v45 }
 0x78b   : > { %v3571_v62 = vsel %vm3566_vm10, %v3563_v43, %v3557_v52 }
 0x78c   : > { %v3583_v21 = vmul.f32 %v6288_v36, %v3571_v62 }
 0x78e   : > { %v3381_v57 = vpop.permute.xlu0 %3380  ;;  %v3683_v5 = vpop.permute.xlu1 %3682  ;;  %v3604_v62 = vmul.f32 %v6170_v41, %v3583_v21 }
 0x78f   : > { %v3391_v16 = vsel %vm3386_vm7, %v3381_v57, %v3375_v13  ;;  %v3388_v42 = vsel %vm3386_vm7, %v3375_v13, %v3381_v57  ;;  %v3688_v20 = vsel %vm3686_vm12, %v6375_v10, %v3683_v5 }
 0x790   : > { %v3403_v11 = vmul.f32 %v6252_v26, %v3391_v16 }
 0x792   : > { %v3424_v59 = vmul.f32 %v6112_v54, %v3403_v11  ;;  %v3503_v58 = vpop.permute.xlu0 %3502  ;;  %v3499_v48 = vpop.permute.xlu1 %3498  ;;  %v3404_v11 = vmul.f32 %v6255_v37, %v3388_v42 }
 0x793   : > { %v3511_v32 = vsel %vm3506_vm9, %v3503_v58, %v3497_v4 }
 0x794   : > { %v3430_v34 = vadd.f32 %v3424_v59, %v3368_v8  ;;  %v3523_v22 = vmul.f32 %v6278_v9, %v3511_v32  ;;  %v3703_v8 = vmul.f32 %v6315_v50, %v3688_v20  ;;  %v3425_v42 = vmul.f32 %v6112_v54, %v3404_v11 }
 0x796   : > { %v3490_v18 = vadd.f32 %v3484_v47, %v3430_v34  ;;  %v3544_v61 = vmul.f32 %v6164_v28, %v3523_v22  ;;  %v3623_v29 = vpop.permute.xlu0 %3622  ;;  %v6403_v16 = vpop.permute.xlu1 %3618  ;;  %v3448_v22 = vsel %vm3446_vm8, %v3437_v38, %v3443_v35  ;;  %v3724_v20 = vmul.f32 %v6202_v17, %v3703_v8 }
 0x797   : > { %v3628_v45 = vsel %vm3626_vm11, %v3617_v56, %v3623_v29 }
 0x798   : > { %v3550_v13 = vadd.f32 %v3544_v61, %v3490_v18  ;;  %v3643_v57 = vmul.f32 %v6295_v40, %v3628_v45  ;;  %v3464_v45 = vmul.f32 %v6270_v63, %v3448_v22 }
 0x79a   : > { %v3610_v59 = vadd.f32 %v3604_v62, %v3550_v13  ;;  %v3664_v32 = vmul.f32 %v6192_v15, %v3643_v57  ;;  %v3743_v47 = vpop.permute.xlu0 %3742  ;;  %v6412_v34 = vpop.permute.xlu1 %3738  ;;  %v3508_v62 = vsel %vm3506_vm9, %v3497_v4, %v3503_v58  ;;  %v3369_v13 = vmul.f32 %v6078_v25, %v6096_v46 }
 0x79b   : > { %v3748_v21 = vsel %vm3746_vm13, %v6377_v6, %v3743_v47  ;;  %v3524_v11 = vmul.f32 %v6281_v12, %v3508_v62  ;;  %v3568_v58 = vsel %vm3566_vm10, %v3557_v52, %v3563_v43  ;;  %v3631_v46 = vsel %vm3626_vm11, %v3623_v29, %v3617_v56 }
 0x79c   : > { %v3670_v18 = vadd.f32 %v3664_v32, %v3610_v59  ;;  %v3763_v61 = vmul.f32 %v6340_v44, %v3748_v21  ;;  %v3431_v54 = vadd.f32 %v3425_v42, %v3369_v13  ;;  %v3485_v59 = vmul.f32 %v6144_v7, %v3464_v45 }
 0x79d   : > { %v3545_v25 = vmul.f32 %v6164_v28, %v3524_v11  ;;  %v3584_v21 = vmul.f32 %v6291_v3, %v3568_v58  ;;  %v3691_v52 = vsel %vm3686_vm12, %v3683_v5, %v6375_v10  ;;  %v3644_v28 = vmul.f32 %v6300_v1, %v3631_v46 }
 0x79e   : > { %v3730_v38 = vadd.f32 %v3724_v20, %v3670_v18  ;;  %v3784_v35 = vmul.f32 %v6220_v0, %v3763_v61  ;;  %v3377_v57 = vpop.permute.xlu0 %3376  ;;  %v6428_v51 = vpop.permute.xlu1 %3798  ;;  %v3491_v22 = vadd.f32 %v3485_v59, %v3431_v54  ;;  %v3704_v13 = vmul.f32 %v6320_v53, %v3691_v52 }
 0x79f   : > { %v3605_v29 = vmul.f32 %v6170_v41, %v3584_v21  ;;  %v3876_v41 = vld [vmem:[%s6637_s13] sm:$0xf] }
 0x7a0   : > { %v6431_v8 = vadd.f32 %v3784_v35, %v3730_v38  ;;  %v3551_v43 = vadd.f32 %v3545_v25, %v3491_v22  ;;  %v3370_v38 = vmul.f32 %v6084_v33, %v6102_v49  ;;  %v3751_v33 = vsel %vm3746_vm13, %v3743_v47, %v6377_v6 }
 0x7a1   : > { %v3725_v47 = vmul.f32 %v6202_v17, %v3704_v13  ;;  %v6483_v59 = vsel %vm3877_vm14, %v3876_v41, 0 }
 0x7a2   : > { %v3439_v32 = vpop.permute.xlu0 %3438  ;;  %v3383_v4 = vpop.permute.xlu1 %3382  ;;  %v3611_v5 = vadd.f32 %v3605_v29, %v3551_v43 }
 0x7a3   : > { %v3389_v42 = vsel %vm3386_vm7, %v3377_v57, %v3383_v4  ;;  %v3392_v20 = vsel %vm3386_vm7, %v3383_v4, %v3377_v57  ;;  %v3764_v4 = vmul.f32 %v6343_v31, %v3751_v33 }
 0x7a4   : > { %v3405_v61 = vmul.f32 %v6252_v26, %v3392_v20  ;;  %v3406_v56 = vmul.f32 %v6255_v37, %v3389_v42  ;;  %v3665_v26 = vmul.f32 %v6192_v15, %v3644_v28  ;;  %v3371_v37 = vmul.f32 %v6086_v39, %v6102_v49 }
 0x7a6   : > { %v3559_v7 = vpop.permute.xlu0 %3558  ;;  %v3505_v18 = vpop.permute.xlu1 %3504  ;;  %v3426_v57 = vmul.f32 %v6118_v55, %v3405_v61  ;;  %v3427_v54 = vmul.f32 %v6118_v55, %v3406_v56 }
 0x7a7   : > { %v3509_v35 = vsel %vm3506_vm9, %v3499_v48, %v3505_v18  ;;  %v3512_v10 = vsel %vm3506_vm9, %v3505_v18, %v3499_v48 }
 0x7a8   : > { %v3525_v15 = vmul.f32 %v6278_v9, %v3512_v10  ;;  %v3526_v48 = vmul.f32 %v6281_v12, %v3509_v35  ;;  %v3671_v12 = vadd.f32 %v3665_v26, %v3611_v5  ;;  %v3433_v25 = vadd.f32 %v3427_v54, %v3371_v37 }
 0x7aa   : > { %v3679_v62 = vpop.permute.xlu0 %3678  ;;  %v3625_v45 = vpop.permute.xlu1 %3624  ;;  %v3546_v21 = vmul.f32 %v6162_v27, %v3525_v15  ;;  %v3547_v42 = vmul.f32 %v6162_v27, %v3526_v48  ;;  %v3731_v33 = vadd.f32 %v3725_v47, %v3671_v12 }
 0x7ab   : > { %v3629_v39 = vsel %vm3626_vm11, %v6403_v16, %v3625_v45  ;;  %v3632_v49 = vsel %vm3626_vm11, %v3625_v45, %v6403_v16  ;;  %v3432_v16 = vadd.f32 %v3426_v57, %v3370_v38  ;;  %v3785_v57 = vmul.f32 %v6220_v0, %v3764_v4 }
 0x7ac   : > { %v3645_v46 = vmul.f32 %v6295_v40, %v3629_v39  ;;  %v3646_v17 = vmul.f32 %v6300_v1, %v3632_v49 }
 0x7ad   : > { %v3791_v4 = vadd.f32 %v3785_v57, %v3731_v33 }
 0x7ae   : > { %v3445_v11 = vpop.permute.xlu0 %3444  ;;  %v3745_v6 = vpop.permute.xlu1 %3744  ;;  %v3666_v61 = vmul.f32 %v6190_v14, %v3645_v46  ;;  %v3667_v56 = vmul.f32 %v6190_v14, %v3646_v17  ;;  %v4492_v14 = vld [vmem:[%s6640_s16 + $0x18] ss:$0 sm:$0xff] }
 0x7af   : > { %v3449_v55 = vsel %vm3446_vm8, %v3439_v32, %v3445_v11  ;;  %v3452_v9 = vsel %vm3446_vm8, %v3445_v11, %v3439_v32 }
 0x7b0   : > { %v3465_v58 = vmul.f32 %v6267_v60, %v3452_v9  ;;  %v3466_v22 = vmul.f32 %v6270_v63, %v3449_v55  ;;  %v3749_v60 = vsel %vm3746_vm13, %v6412_v34, %v3745_v6  ;;  %v3752_v63 = vsel %vm3746_vm13, %v3745_v6, %v6412_v34  ;;  %v6758_v6 = vld [vmem:[#allocation21_spill] sm:$0xff] }
 0x7b1   : > { %v3765_v35 = vmul.f32 %v6340_v44, %v3749_v60  ;;  %v3766_v10 = vmul.f32 %v6343_v31, %v3752_v63  ;;  %v6757_v31 = vld [vmem:[#allocation19_spill] sm:$0xff] }
 0x7b2   : > { %v3486_v32 = vmul.f32 %v6150_v19, %v3465_v58  ;;  %v3487_v20 = vmul.f32 %v6150_v19, %v3466_v22  ;;  %v3565_v18 = vpop.permute.xlu0 %3564  ;;  %v3805_v52 = vpop.permute.xlu1 %3804  ;;  %v6759_v58 = vld [vmem:[#allocation24_spill] sm:$0xff] }
 0x7b3   : > { %v3569_v40 = vsel %vm3566_vm10, %v3559_v7, %v3565_v18  ;;  %v3572_v27 = vsel %vm3566_vm10, %v3565_v18, %v3559_v7  ;;  %v3809_v34 = vsel %vm3806_vm15, %v6428_v51, %v3805_v52  ;;  %v3812_v29 = vsel %vm3806_vm15, %v3805_v52, %v6428_v51 }
 0x7b4   : > { %v3492_v1 = vadd.f32 %v3486_v32, %v3432_v16  ;;  %v3493_v43 = vadd.f32 %v3487_v20, %v3433_v25  ;;  %v3585_v19 = vmul.f32 %v6288_v36, %v3572_v27  ;;  %v3586_v28 = vmul.f32 %v6291_v3, %v3569_v40  ;;  %v4491_v3 = vld [vmem:[%s6640_s16 + $0x10] ss:$0 sm:$0xff] }
 0x7b5   : > { %v3825_v54 = vmul.f32 %v4491_v3, %v3809_v34  ;;  %v3826_v15 = vmul.f32 %v4492_v14, %v3812_v29  ;;  %v3787_v55 = vmul.f32 %v6758_v6, %v3766_v10  ;;  %v6544_v25 = vand.u32 4294901760, %v6483_v59  ;;  %v6761_v29 = vld [vmem:[#allocation22_spill] sm:$0xff] }
 0x7b6   : > { %v3552_v45 = vadd.f32 %v3546_v21, %v3492_v1  ;;  %v3553_v7 = vadd.f32 %v3547_v42, %v3493_v43  ;;  %v3606_v13 = vmul.f32 %v6184_v2, %v3585_v19  ;;  %v3607_v36 = vmul.f32 %v6184_v2, %v3586_v28  ;;  %v3685_v38 = vpop.permute.xlu0 %3684  ;;  %v3801_v21 = vpop.permute.xlu1 %3800  ;;  %v6760_v42 = vld [vmem:[#allocation23_spill] sm:$0xff] }
 0x7b7   : > { %v3689_v51 = vsel %vm3686_vm12, %v3679_v62, %v3685_v38  ;;  %v3692_v5 = vsel %vm3686_vm12, %v3685_v38, %v3679_v62  ;;  %v3786_v62 = vmul.f32 %v6758_v6, %v3765_v35  ;;  %v3846_v22 = vmul.f32 %v6759_v58, %v3825_v54 }
 0x7b8   : > { %v3612_v2 = vadd.f32 %v3606_v13, %v3552_v45  ;;  %v3613_v26 = vadd.f32 %v3607_v36, %v3553_v7  ;;  %v3705_v37 = vmul.f32 %v6315_v50, %v3689_v51  ;;  %v3706_v41 = vmul.f32 %v6320_v53, %v3692_v5 }
 0x7b9   : > { %v3847_v16 = vmul.f32 %v6759_v58, %v3826_v15  ;;  %v6555_v19 = vsub.f32 %v6483_v59, %v6544_v25 }
 0x7ba   : > { %v3672_v44 = vadd.f32 %v3666_v61, %v3612_v2  ;;  %v3673_v48 = vadd.f32 %v3667_v56, %v3613_v26  ;;  %v3726_v39 = vmul.f32 %v6757_v31, %v3705_v37  ;;  %v3727_v49 = vmul.f32 %v6757_v31, %v3706_v41  ;;  %v3803_v11 = vpop.permute.xlu0 %3802 }
 0x7bb   : > { %v3808_v50 = vsel %vm3806_vm15, %v6379_v30, %v3803_v11  ;;  %v3811_v0 = vsel %vm3806_vm15, %v3803_v11, %v6379_v30  ;;  %v3958_v10 = vand.u32 4294901760, %v6555_v19 }
 0x7bc   : > { %v3732_v53 = vadd.f32 %v3726_v39, %v3672_v44  ;;  %v3733_v47 = vadd.f32 %v3727_v49, %v3673_v48  ;;  %v3823_v9 = vmul.f32 %v4491_v3, %v3808_v50  ;;  %v3824_v12 = vmul.f32 %v4492_v14, %v3811_v0 }
 0x7be   : > { %v3792_v46 = vadd.f32 %v3786_v62, %v3732_v53  ;;  %v3793_v17 = vadd.f32 %v3787_v55, %v3733_v47  ;;  %v3844_v32 = vmul.f32 %v6760_v42, %v3823_v9  ;;  %v3845_v20 = vmul.f32 %v6760_v42, %v3824_v12  ;;  %v3795_v30 = vpop.permute.xlu0 %3794 }
 0x7bf   : > { %v3807_v18 = vsel %vm3806_vm15, %v3795_v30, %v3801_v21  ;;  %v3810_v52 = vsel %vm3806_vm15, %v3801_v21, %v3795_v30 }
 0x7c0   : > { %v3852_v60 = vadd.f32 %v3846_v22, %v3792_v46  ;;  %v3853_v63 = vadd.f32 %v3847_v16, %v3793_v17  ;;  %v3850_v40 = vadd.f32 %v3844_v32, %v6431_v8  ;;  %v3851_v27 = vadd.f32 %v3845_v20, %v3791_v4 }
 0x7c1   : > { %v3821_v1 = vmul.f32 %v4491_v3, %v3807_v18  ;;  %v3822_v43 = vmul.f32 %v4492_v14, %v3810_v52  ;;  %v6762_v14 = vld [vmem:[#allocation25_spill] sm:$0xff]  ;;  %v6763_v32 = vmov 0.0  }
 0x7c2   : > { %v3863_v28 = vrot.slane %v3852_v60, 4  ;;  %v3856_v61 = vmax.f32 %v3850_v40, 0.0  ;;  %v3857_v56 = vmax.f32 %v3851_v27, 0.0  ;;  %v3862_v34 = vrot.slane %v3850_v40, 4 }
 0x7c3   : > { %v3842_v45 = vmul.f32 %v6761_v29, %v3821_v1  ;;  %v3843_v23 = vmul.f32 %v6761_v29, %v3822_v43  ;;  %v3866_v7 = vrot.slane %v3853_v63, 4  ;;  %v3865_v13 = vrot.slane %v3851_v27, 4  ;;  %v6766_v63 = vld [vmem:[#allocation20_spill] sm:$0xff] }
 0x7c4   : > { %v3874_v36 = vmul.f32 %v3863_v28, %v3856_v61  ;;  %v3864_v8 = vsel %vm591_vm0, %v3862_v34, %v3863_v28 }
 0x7c5   : > { %v3848_v3 = vadd.f32 %v3842_v45, %v6371_v24  ;;  %v3849_v38 = vadd.f32 %v3843_v23, %v6762_v14  ;;  %v3875_v35 = vmul.f32 %v3866_v7, %v3857_v56  ;;  %v3867_v37 = vsel %vm591_vm0, %v3865_v13, %v3866_v7 }
 0x7c6   : > { %v3882_v59 = vsel %vm591_vm0, %v3874_v36, 0  ;;  %v3959_v24 = vsub.f32 %v6555_v19, %v3958_v10 }
 0x7c7   : > { %v3854_v51 = vmax.f32 %v3848_v3, 0.0  ;;  %v3855_v5 = vmax.f32 %v3849_v38, 0.0  ;;  %v3885_v2 = vsel %vm591_vm0, %v3875_v35, 0  ;;  %v3893_v26 = vand.u32 4294901760, %v3882_v59 }
 0x7c8   : > { %v3891_v41 = vand.u32 4294901760, %v3885_v2  ;;  %v3960_v55 = vand.u32 4294901760, %v3959_v24 }
 0x7c9   : > { %v3872_v33 = vmul.f32 %v3864_v8, %v3854_v51  ;;  %v3873_v57 = vmul.f32 %v3867_v37, %v3855_v5  ;;  %v3986_v54 = vsub.f32 %v3882_v59, %v3893_v26 }
 0x7ca   : > { %v3980_v15 = vsub.f32 %v3885_v2, %v3891_v41 }
 0x7cb   : > { %v3887_v44 = vand.u32 4294901760, %v3873_v57  ;;  %v3889_v48 = vand.u32 4294901760, %v3872_v33  ;;  %v3987_v31 = vand.u32 4294901760, %v3986_v54 }
 0x7cc   : > { %v3981_v39 = vand.u32 4294901760, %v3980_v15 }
 0x7cd   : > { %v4926_v49 = vpack.c.bf16 %v3891_v41, %v3887_v44  ;;  %v3968_v11 = vsub.f32 %v3873_v57, %v3887_v44  ;;  %v4928_v6 = vpack.c.bf16 %v3893_v26, %v3889_v48  ;;  %v3974_v62 = vsub.f32 %v3872_v33, %v3889_v48 }
 0x7ce   : > { %v3982_v50 = vsub.f32 %v3980_v15, %v3981_v39  ;;  %v3988_v0 = vsub.f32 %v3986_v54, %v3987_v31 }
 0x7cf   : > { %4927 = vmatprep.subr.bf16.mxu0 %v4926_v49  ;;  %v3969_v53 = vand.u32 4294901760, %v3968_v11  ;;  %v3975_v47 = vand.u32 4294901760, %v3974_v62  ;;  %v4934_v9 = vpack.c.bf16 %v3980_v15, %v3968_v11  ;;  %v4936_v12 = vpack.c.bf16 %v3986_v54, %v3974_v62 }
 0x7d0   : > { %4929 = vmatpush1.bf16.msra.mxu0 %v4928_v6  ;;  %v3983_v17 = vand.u32 4294901760, %v3982_v50  ;;  %v3989_v42 = vand.u32 4294901760, %v3988_v0 }
 0x7d1   : > { %v3970_v4 = vsub.f32 %v3968_v11, %v3969_v53  ;;  %v3976_v58 = vsub.f32 %v3974_v62, %v3975_v47  ;;  %v4942_v22 = vpack.c.bf16 %v3981_v39, %v3969_v53  ;;  %v4944_v16 = vpack.c.bf16 %v3987_v31, %v3975_v47 }
 0x7d3   : > { %3961 = vmatmul.mubr.f32.vlgmr.msra.gmra.mrb[14].mxu0 %v3960_v55  ;;  %v3971_v46 = vand.u32 4294901760, %v3970_v4  ;;  %v3977_v21 = vand.u32 4294901760, %v3976_v58 }
 0x7d4   : > { %4051 = vmatprep.mubr.f32.mxu0 %v6763_v32 }
 0x7d5   : > { %v4930_v20 = vpack.c.bf16 %v3983_v17, %v3971_v46  ;;  %v4932_v30 = vpack.c.bf16 %v3989_v42, %v3977_v21 }
 0x7d7   : > { %4931 = vmatprep.subr.bf16.mxu0 %v4930_v20 }
 0x7d8   : > { %4933 = vmatpush1.bf16.msra.mxu0 %v4932_v30 }
 0x7d9   : > { %4935 = vmatprep.subr.bf16.mxu0 %v4934_v9 }
 0x7db   : > { %4053 = vmatmul.mubr.f32.vlgmr.msra.gmra.mrb[14].mxu0 %v6544_v25 }
 0x7dc   : > { %4937 = vmatpush1.bf16.msra.mxu0 %v4936_v12  ;;  %4131 = vmatprep.mubr.f32.mxu0 %v6763_v32 }
 0x7dd   : > { %4939 = vmatprep.subr.bf16.mxu0 %v4926_v49 }
 0x7e3   : > { %4134 = vmatmul.mubr.f32.vlgmr.msra.gmra.mrb[14].mxu0 %v6555_v19 }
 0x7e4   : > { %4941 = vmatpush1.bf16.msra.mxu0 %v4928_v6  ;;  %4208 = vmatprep.mubr.f32.mxu0 %v6763_v32 }
 0x7e5   : > { %4943 = vmatprep.subr.bf16.mxu0 %v4942_v22 }
 0x7eb   : > { %4212 = vmatmul.mubr.f32.vlgmr.msra.gmra.mrb[14].mxu0 %v3958_v10 }
 0x7ec   : > { %4945 = vmatpush1.bf16.msra.mxu0 %v4944_v16  ;;  %4294 = vmatprep.mubr.f32.mxu0 %v6763_v32 }
 0x7ed   : > { %4947 = vmatprep.subr.bf16.mxu0 %v4926_v49 }
 0x7f3   : > { %4296 = vmatmul.mubr.f32.vlgmr.msra.gmra.mrb[14].mxu0 %v6544_v25 }
 0x7f4   : > { %4949 = vmatpush1.bf16.msra.mxu0 %v4928_v6  ;;  %4370 = vmatprep.mubr.f32.mxu0 %v6763_v32 }
 0x7fb   : > { %4372 = vmatmul.mubr.f32.vlgmr.msra.gmra.mrb[14].mxu0 %v6544_v25 }
 0x8ce   : > { %v4373_v18 = vpop.f32.mrb[14].mxu0 }
 0x8cf   : > { %v4375_v52 = vpop.f32.mrb[15].mxu0 }
 0x8d0   : > { %v4380_v60 = vcombine.low %v4373_v18, %v4375_v52 }
 0x8d2   : > { %v4382_v40 = vadd.f32 %v4380_v60, %v6766_v63 }
 0x8d4   : > { %4383 = vst [vmem:[%s571_s24] sm:$0xff] %v4382_v40 }
 0x8d5   : > { %5186 = shalt.err (!%p5183_p11)
}
 0x8d6   : > { %s5187_s1 = scalar_lea.hbm %s6582_s22, 128  ;;  %s5191_s26 = scalar_lea.hbm %s6767_s20, 256 }
 0x8d7   : > { %p5188_p13 = scmp.ne.s32.totalorder %s6582_s22, %s5187_s1  ;;  %p5192_p6 = scmp.lt.u32.totalorder %s6582_s22, %s6767_s20 }
 0x8d8   : > { %p5193_p9 = scmp.lt.u32.totalorder %s5191_s26, %s5187_s1  ;;  %p5195_p12 = scmp.lt.u32.totalorder %s5187_s1, %s6582_s22 }
 0x8d9   : > { %p5189_p5 = pnand %p5188_p13, %p6768_p1 }
 0x8da   : > { %p5194_p10 = por %p5193_p9, %p5192_p6 }
 0x8db   : > { %p5190_p0 = pneg %p5189_p5 }
 0x8dc   : > { %p5196_p2 = por %p5195_p12, %p5194_p10 }
 0x8de   : > { %p5197_p3 = pnand %p5196_p2, %p5190_p0 }
 0x8e0   : > { %5200 = shalt.err (!%p5197_p3)
}
 0x8e1   : > { %5035 = dma.vmem_to_hbm [thread:$0]  (%p6768_p1), %s6584_s19, 128, %s6582_s22, %s4385_s30  }
 0x8e2 PF: > { %s6769_s0 = sld [smem:[#allocation14_spill]]  ;;  %s6770_s23 = sld [smem:[#allocation11_spill]] }
 0x8e3   : > { %s6771_s28 = sld [smem:[#allocation18_spill]] }
 0x8e8   : > { %p5052_p4 = scmp.ge.s32.totalorder %s6769_s0, 2  ;;  %s4411_s17 = sand.u32 1, %s6770_s23  }
 0x8e9   : > { %p6772_p7 = scmp.ne.s32.totalorder %s6771_s28, 0  ;;  %s4412_s25 = scalar_lea.sflag [#allocation4], %s4411_s17 }
 0x8eb   : > { %p5045_p8 = pnand %p5052_p4, %p6772_p7 }
 0x8ed   : > { %5226 = dma.done.wait (!%p5045_p8), %s4412_s25, 128  }
 0x8ee   : > { %5228 = vsyncadd (!%p5045_p8), %s4412_s25, 4294967168  ;;  %s6773_s27 = sld [smem:[#allocation15_spill]]  ;;  %s6774_s24 = sld [smem:[#allocation12_spill]] }
 0x8ef   : > { %s6775_s25 = sld [smem:[#allocation13_spill]]  ;;  %s6776_s26 = sld [smem:[#allocation16_spill]] }
 0x8f4   : > { %p29_p11 = scmp.ge.s32.totalorder %s6773_s27, 4  }
 0x8f6   :  { %31 = sbr.rel (!%p29_p11) target bundleno = 9 (0x9), region = 132 }
 0x8fd   :  { %4417 = vsyncpa [#allocation3], 1 }
 0x8fe   :  { %4419 = vsyncpa [#allocation3 + $0x1], 1 }
 0x8ff   :  { %4420 = vsyncpa [#allocation6], 1 }
 0x900   :  { %4421 = vsyncpa [#allocation4], 1 }
 0x901   :  { %4423 = vsyncpa [#allocation4 + $0x1], 1 }

</bundles_post_ra>
